<compile_context>
chip_gen: v6e
topology: v6e:2x2x1
jax: 0.10.0
libtpu: 0.0.40
codegen_flags: <defaults>
</compile_context>

<pallas_src>
import functools

import jax
import jax.numpy as jnp
from jax.experimental import pallas as pl
from jax.experimental.pallas import tpu as pltpu


# ---------------------------------------------------------------------------
# Kernel: one grid step handles `block_b` batch elements end-to-end.
# ---------------------------------------------------------------------------
def encoder_kernel(x_ref, mask_ref, wqkv_ref, bqkv_ref, wo_ref, w1_ref, w2_ref,
                   vecs_ref, out_ref, attn_ref, *,
                   num_heads, head_dim, matmul_dtype, flat_out, flat_attn):
    H, hd = num_heads, head_dim
    HD = H * hd
    Bb, S, D = x_ref.shape
    R = Bb * S                                   # rows per step = MXU M dimension

    def mm(a, b):
        # Optional bf16 operands with f32 accumulation (2x MXU throughput on v6e/v7x).
        if matmul_dtype is not None:
            a, b = a.astype(matmul_dtype), b.astype(matmul_dtype)
        return jnp.dot(a, b, preferred_element_type=jnp.float32)

    def bmm(subs, a, b):
        if matmul_dtype is not None:
            a, b = a.astype(matmul_dtype), b.astype(matmul_dtype)
        return jnp.einsum(subs, a, b, preferred_element_type=jnp.float32)

    xf = x_ref[...].reshape(R, D)                # (R, D), leading-dim merge (free)

    # ---- fused Q/K/V projection: ONE wide (R, D) @ (D, 3*H*hd) MXU matmul ----
    qkv = (mm(xf, wqkv_ref[...]) + bqkv_ref[...]).reshape(Bb, S, 3 * HD)

    scale = 1.0 / (hd ** 0.5)
    # Finite negative bias instead of -inf: a fully-masked query row stays NaN-free.
    neg = jnp.where(mask_ref[...] == 0.0, -1e30, 0.0)            # (Bb, 1, S) keys

    # ---- per-head masked softmax attention (loop unrolled at trace time) ----
    ctx_parts = []
    attn_acc = None
    for h in range(H):
        q_h = qkv[:, :, h * hd:(h + 1) * hd]                      # (Bb, S, hd)
        k_h = qkv[:, :, HD + h * hd:HD + (h + 1) * hd]
        v_h = qkv[:, :, 2 * HD + h * hd:2 * HD + (h + 1) * hd]

        s_h = bmm('bqe,bke->bqk', q_h, k_h) * scale + neg         # (Bb, S, S)
        s_h = s_h - jnp.max(s_h, axis=-1, keepdims=True)
        e_h = jnp.exp(s_h)
        # Exact reciprocal of the small (Bb, S, 1) denominator: the attention
        # weights are a kernel output, so keep them accurate vs. the reference.
        p_h = e_h * (1.0 / jnp.sum(e_h, axis=-1, keepdims=True))
        attn_acc = p_h if attn_acc is None else attn_acc + p_h
        ctx_parts.append(bmm('bqk,bke->bqe', p_h, v_h))           # (Bb, S, hd)

    attn = attn_acc * (1.0 / H)                                   # mean over heads
    attn_ref[...] = attn.reshape(Bb, 1, S * S) if flat_attn else attn

    # ---- output projection: ONE (R, H*hd) @ (H*hd, D) matmul --------------------
    ctx = jnp.concatenate(ctx_parts, axis=-1).reshape(R, HD)
    vecs = vecs_ref[...]                                          # (7, D) packed vectors
    bo, b1, b2 = vecs[0:1], vecs[1:2], vecs[2:3]
    g1, beta1, g2, beta2 = vecs[3:4], vecs[4:5], vecs[5:6], vecs[6:7]

    mha = mm(ctx, wo_ref[...]) + bo                               # (R, D)

    def layernorm(y, g, b):
        mu = jnp.mean(y, axis=-1, keepdims=True)
        var = jnp.mean(jnp.square(y - mu), axis=-1, keepdims=True)
        return (y - mu) * jax.lax.rsqrt(var + 1e-5) * g + b

    # TODO(synk): dropout is identity (eval-mode semantics).
    y1 = layernorm(mha + xf, g1, beta1)                           # (R, D)

    # ---- Conv1d(k=1) -> ReLU -> Conv1d(k=1) == pointwise MLP over channels ----
    h1 = jnp.maximum(mm(y1, w1_ref[...]) + b1, 0.0)
    h2 = mm(h1, w2_ref[...]) + b2

    out = layernorm(h2 + y1, g2, beta2)                           # (R, D)
    out_ref[...] = out.reshape(Bb, 1, S * D) if flat_out else out.reshape(Bb, S, D)


# ---------------------------------------------------------------------------
# Wrapper
# ---------------------------------------------------------------------------
def _vmem_limit_bytes():
    """<=48 MiB when physical VMEM is 64 MiB/TC (v7x), 64 MiB on v5e/v6e (128 MiB)."""
    try:
        cap = pltpu.get_tpu_info().vmem_capacity_bytes
    except Exception:
        return 48 * 1024 * 1024          # conservative default: safe on every generation
    return 48 * 1024 * 1024 if cap <= 64 * 1024 * 1024 else 64 * 1024 * 1024


def _choose_block_b(B, S, D, H, vmem_budget, target_rows=256):
    """Fold batch elements so block_b*S ~ target MXU M rows (256 for the 256-wide
    v6e/v7x MXU; 128 already fills v5e), clamped by a VMEM footprint formula and
    capped at B//2 so the "parallel" grid axis has >=2 steps (v7x megacore)."""
    bb = max(1, min(B, target_rows // max(S, 1)))
    if B >= 2:
        bb = min(bb, B // 2)
    bb = max(bb, 1)

    def live_bytes(n):
        # ~3 live S x S copies per head (scores/exp/probs) + double-buffered
        # x / out / attn blocks; weights excluded (constant index, single buffer).
        return (3 * H * n * S * S * 4
                + 2 * 2 * n * S * D * 4
                + 2 * n * S * S * 4)

    while bb > 1 and live_bytes(bb) > vmem_budget // 2:
        bb -= 1
    while B % bb:                         # keep a divisor of B so every block is full
        bb -= 1
    return bb


def encoder_forward(x, mask, params, *, num_heads, head_dim, block_b=None,
                    matmul_dtype=None, weight_buffer_count=1,
                    lane_dense_outputs=True):
    B, S, D = x.shape
    H, hd = num_heads, head_dim
    HD = H * hd

    vmem_limit = _vmem_limit_bytes()
    if block_b is None:
        block_b = _choose_block_b(B, S, D, H, vmem_limit)
    assert B % block_b == 0
    grid = (B // block_b,)

    # Lane-dense output slabs only when the natural last dim is not already a
    # multiple of 128 (for real d_model the natural (B, S, D) layout is lane-dense).
    flat_out = lane_dense_outputs and (D % 128 != 0)
    flat_attn = lane_dense_outputs and (S % 128 != 0)

    kern = functools.partial(encoder_kernel, num_heads=H, head_dim=hd,
                             matmul_dtype=matmul_dtype,
                             flat_out=flat_out, flat_attn=flat_attn)

    def const_spec(shape):
        idx = lambda b: (0,) * len(shape)
        if weight_buffer_count is None:
            return pl.BlockSpec(shape, idx)
        # Constant-index inputs are fetched once and revisited across the batch
        # grid; a single pipeline buffer halves their VMEM footprint.
        return pl.BlockSpec(shape, idx, pipeline_mode=pl.Buffered(weight_buffer_count))

    in_specs = [
        pl.BlockSpec((block_b, S, D), lambda b: (b, 0, 0)),        # x
        pl.BlockSpec((block_b, 1, S), lambda b: (b, 0, 0)),        # mask (B, 1, S)
        const_spec((D, 3 * HD)),                                   # wqkv  [Wq | Wk | Wv]
        const_spec((1, 3 * HD)),                                   # bqkv
        const_spec((HD, D)),                                       # wo
        const_spec((D, D)),                                        # conv w1
        const_spec((D, D)),                                        # conv w2
        const_spec((7, D)),                                        # bo,b1,b2,g1,beta1,g2,beta2
    ]

    if flat_out:
        out_spec0 = pl.BlockSpec((block_b, 1, S * D), lambda b: (b, 0, 0))
        out_shape0 = jax.ShapeDtypeStruct((B, 1, S * D), jnp.float32)
    else:
        out_spec0 = pl.BlockSpec((block_b, S, D), lambda b: (b, 0, 0))
        out_shape0 = jax.ShapeDtypeStruct((B, S, D), jnp.float32)
    if flat_attn:
        out_spec1 = pl.BlockSpec((block_b, 1, S * S), lambda b: (b, 0, 0))
        out_shape1 = jax.ShapeDtypeStruct((B, 1, S * S), jnp.float32)
    else:
        out_spec1 = pl.BlockSpec((block_b, S, S), lambda b: (b, 0, 0))
        out_shape1 = jax.ShapeDtypeStruct((B, S, S), jnp.float32)

    out, attn = pl.pallas_call(
        kern,
        grid=grid,
        in_specs=in_specs,
        out_specs=(out_spec0, out_spec1),
        out_shape=(out_shape0, out_shape1),
        compiler_params=pltpu.CompilerParams(
            dimension_semantics=("parallel",),      # megacore sharding on v7x
            vmem_limit_bytes=vmem_limit,
        ),
    )(x, mask.reshape(B, 1, S),
      params["wqkv"], params["bqkv"], params["wo"],
      params["w1"], params["w2"], params["vecs"])

    return out.reshape(B, S, D), attn.reshape(B, S, S)


# ---------------------------------------------------------------------------
# Pure-JAX reference (PyTorch semantics; consumes the same packed params)
# ---------------------------------------------------------------------------
def encoder_ref(x, mask, params, *, num_heads, head_dim):
    H, hd = num_heads, head_dim
    B, S, D = x.shape
    HD = H * hd
    qkv = x @ params["wqkv"] + params["bqkv"]
    q, k, v = qkv[..., :HD], qkv[..., HD:2 * HD], qkv[..., 2 * HD:]

    def heads(t):                         # (B, S, H*hd) -> (B, H, S, hd)
        return t.reshape(B, S, H, hd).transpose(0, 2, 1, 3)

    q, k, v = heads(q), heads(k), heads(v)
    scores = jnp.einsum('bhqe,bhke->bhqk', q, k) / (hd ** 0.5)
    scores = jnp.where(mask[:, None, None, :] == 0.0, -jnp.inf, scores)
    probs = jax.nn.softmax(scores, axis=-1)
    attn = jnp.mean(probs, axis=1)
    ctx = jnp.einsum('bhqk,bhke->bqhe', probs, v).reshape(B, S, HD)

    bo, b1, b2, g1, beta1, g2, beta2 = params["vecs"]
    mha = ctx @ params["wo"] + bo

    def ln(y, g, b):
        mu = jnp.mean(y, axis=-1, keepdims=True)
        var = jnp.mean((y - mu) ** 2, axis=-1, keepdims=True)
        return (y - mu) / jnp.sqrt(var + 1e-5) * g + b

    y1 = ln(mha + x, g1, beta1)
    h1 = jnp.maximum(y1 @ params["w1"] + b1, 0.0)
    h2 = h1 @ params["w2"] + b2
    out = ln(h2 + y1, g2, beta2)
    return out, attn


# ---------------------------------------------------------------------------
def make_params(key, d_model, head_dim, num_heads):
    HD = num_heads * head_dim
    ks = jax.random.split(key, 8)
    n = lambda k, shp, s=0.05: (s * jax.random.normal(k, shp)).astype(jnp.float32)
    bo, b1, b2 = n(ks[3], (d_model,)), n(ks[5], (d_model,)), n(ks[7], (d_model,))
    ones = jnp.ones((d_model,), jnp.float32)
    zeros = jnp.zeros((d_model,), jnp.float32)
    return {
        # Fused [Wq | Wk | Wv]; within each third, columns h*hd:(h+1)*hd are head h
        # (matches PyTorch's Linear + .view(B, S, H, hd)).
        "wqkv": n(ks[0], (d_model, 3 * HD)),
        "bqkv": n(ks[1], (1, 3 * HD)),
        "wo":   n(ks[2], (HD, d_model)),
        # Conv1d(k=1) weights stored as (in, out) so y @ w == conv over channels.
        "w1":   n(ks[4], (d_model, d_model)),
        "w2":   n(ks[6], (d_model, d_model)),
        # Packed small vectors (one DMA): bo, b1, b2, ln1 gamma/beta, ln2 gamma/beta.
        "vecs": jnp.stack([bo, b1, b2, ones, zeros, ones, zeros], axis=0),
    }


if __name__ == "__main__":
    B, S = 2, 8
    d_model = 32      # d_model
    head_dim = 8      # q (per-head hidden size)
    num_heads = 4     # h

    key = jax.random.PRNGKey(0)
    kx, kp = jax.random.split(key)
    x = jax.random.normal(kx, (B, S, d_model), dtype=jnp.float32)
    # mask: 1 = keep, 0 = masked key position (every row keeps >= 1 valid key)
    mask = jnp.ones((B, S), jnp.float32).at[0, -2:].set(0.0).at[1, 0].set(0.0)

    params = make_params(kp, d_model, head_dim, num_heads)

    run = functools.partial(encoder_forward, num_heads=num_heads, head_dim=head_dim)
    # Feature-fallback chain: retry without single-buffered weights / lane-dense
    # slabs on JAX builds that reject those lowering features.
    attempts = ({},
                {"weight_buffer_count": None},
                {"weight_buffer_count": None, "lane_dense_outputs": False})
    last_err = None
    for kwargs in attempts:
        try:
            out, attn = run(x, mask, params, **kwargs)
            last_err = None
            break
        except Exception as e:          # pragma: no cover - older-JAX fallback
            last_err = e
    if last_err is not None:
        raise last_err
    jax.block_until_ready((out, attn))

    ref_out, ref_attn = encoder_ref(x, mask, params,
                                    num_heads=num_heads, head_dim=head_dim)
    assert jnp.allclose(out, ref_out, atol=1e-3, rtol=1e-3), "output mismatch"
    assert jnp.allclose(attn, ref_attn, atol=1e-3, rtol=1e-3), "attention mismatch"

    print("KERNEL_OK")
</pallas_src>

<mosaic_0001>
module attributes {stable_mosaic.version = 11 : i64} {
  func.func @encoder_kernel(%arg0: i32, %arg1: memref<1x8x32xf32, #tpu.memory_space<vmem>>, %arg2: memref<1x1x8xf32, #tpu.memory_space<vmem>>, %arg3: memref<32x96xf32, #tpu.memory_space<vmem>>, %arg4: memref<1x96xf32, #tpu.memory_space<vmem>>, %arg5: memref<32x32xf32, #tpu.memory_space<vmem>>, %arg6: memref<32x32xf32, #tpu.memory_space<vmem>>, %arg7: memref<32x32xf32, #tpu.memory_space<vmem>>, %arg8: memref<7x32xf32, #tpu.memory_space<vmem>>, %arg9: memref<1x1x256xf32, #tpu.memory_space<vmem>>, %arg10: memref<1x1x64xf32, #tpu.memory_space<vmem>>) attributes {dimension_semantics = [#tpu.dimension_semantics<parallel>], iteration_bounds = array<i64: 2>, scalar_prefetch = 0 : i64, scratch_operands = 0 : i64, tpu.core_type = #tpu.core_type<tc>, window_params = [{transform_indices = @transform_0, window_bounds = array<i64: 1, 8, 32>}, {transform_indices = @transform_1, window_bounds = array<i64: 1, 1, 8>}, {pipeline_mode = #tpu.pipeline_mode<synchronous>, transform_indices = @transform_2, window_bounds = array<i64: 32, 96>}, {pipeline_mode = #tpu.pipeline_mode<synchronous>, transform_indices = @transform_3, window_bounds = array<i64: 1, 96>}, {pipeline_mode = #tpu.pipeline_mode<synchronous>, transform_indices = @transform_4, window_bounds = array<i64: 32, 32>}, {pipeline_mode = #tpu.pipeline_mode<synchronous>, transform_indices = @transform_5, window_bounds = array<i64: 32, 32>}, {pipeline_mode = #tpu.pipeline_mode<synchronous>, transform_indices = @transform_6, window_bounds = array<i64: 32, 32>}, {pipeline_mode = #tpu.pipeline_mode<synchronous>, transform_indices = @transform_7, window_bounds = array<i64: 7, 32>}, {transform_indices = @transform_8, window_bounds = array<i64: 1, 1, 256>}, {transform_indices = @transform_9, window_bounds = array<i64: 1, 1, 64>}]} {
    %c0 = arith.constant 0 : index
    %c0_0 = arith.constant 0 : index
    %c0_1 = arith.constant 0 : index
    %0 = vector.load %arg1[%c0, %c0_0, %c0_1] : memref<1x8x32xf32, #tpu.memory_space<vmem>>, vector<1x8x32xf32>
    %1 = vector.shape_cast %0 : vector<1x8x32xf32> to vector<8x32xf32>
    %c0_2 = arith.constant 0 : index
    %c0_3 = arith.constant 0 : index
    %2 = vector.load %arg3[%c0_2, %c0_3] : memref<32x96xf32, #tpu.memory_space<vmem>>, vector<32x96xf32>
    %cst = arith.constant dense<0.000000e+00> : vector<8x96xf32>
    %3 = tpu.matmul %1, %2, %cst {dimension_numbers = #tpu.dot_dimension_numbers<[1], [0], [0], [1], [0, 0, 1, 1], [], []>} : vector<8x32xf32>, vector<32x96xf32>, vector<8x96xf32> -> vector<8x96xf32>
    %c0_4 = arith.constant 0 : index
    %c0_5 = arith.constant 0 : index
    %4 = vector.load %arg4[%c0_4, %c0_5] : memref<1x96xf32, #tpu.memory_space<vmem>>, vector<1x96xf32>
    %5 = vector.broadcast %4 : vector<1x96xf32> to vector<8x96xf32>
    %6 = arith.addf %3, %5 : vector<8x96xf32>
    %7 = vector.shape_cast %6 : vector<8x96xf32> to vector<1x8x96xf32>
    %c0_6 = arith.constant 0 : index
    %c0_7 = arith.constant 0 : index
    %c0_8 = arith.constant 0 : index
    %8 = vector.load %arg2[%c0_6, %c0_7, %c0_8] : memref<1x1x8xf32, #tpu.memory_space<vmem>>, vector<1x1x8xf32>
    %cst_9 = arith.constant 0.000000e+00 : f32
    %9 = vector.broadcast %cst_9 : f32 to vector<1x1x8xf32>
    %10 = arith.cmpf oeq, %8, %9 : vector<1x1x8xf32>
    %cst_10 = arith.constant -1.000000e+30 : f32
    %cst_11 = arith.constant 0.000000e+00 : f32
    %11 = vector.broadcast %cst_10 : f32 to vector<1x1x8xf32>
    %12 = vector.broadcast %cst_11 : f32 to vector<1x1x8xf32>
    %13 = arith.select %10, %11, %12 : vector<1x1x8xi1>, vector<1x1x8xf32>
    %14 = vector.extract_strided_slice %7 {offsets = [0, 0, 0], sizes = [1, 8, 8], strides = [1, 1, 1]} : vector<1x8x96xf32> to vector<1x8x8xf32>
    %15 = vector.extract_strided_slice %7 {offsets = [0, 0, 32], sizes = [1, 8, 8], strides = [1, 1, 1]} : vector<1x8x96xf32> to vector<1x8x8xf32>
    %16 = vector.extract_strided_slice %7 {offsets = [0, 0, 64], sizes = [1, 8, 8], strides = [1, 1, 1]} : vector<1x8x96xf32> to vector<1x8x8xf32>
    "tpu.trace_start"() <{level = 10 : i32, message = "bqe,bke->bqk"}> : () -> ()
    %cst_12 = arith.constant dense<0.000000e+00> : vector<1x8x8xf32>
    %17 = tpu.matmul %14, %15, %cst_12 {dimension_numbers = #tpu.dot_dimension_numbers<[2], [2], [1], [1], [0, 0, 0, 1, 1, 1], [0], [0]>} : vector<1x8x8xf32>, vector<1x8x8xf32>, vector<1x8x8xf32> -> vector<1x8x8xf32>
    "tpu.trace_stop"() : () -> ()
    %cst_13 = arith.constant 0.353553385 : f32
    %18 = vector.broadcast %cst_13 : f32 to vector<1x8x8xf32>
    %19 = arith.mulf %17, %18 : vector<1x8x8xf32>
    %20 = vector.broadcast %13 : vector<1x1x8xf32> to vector<1x8x8xf32>
    %21 = arith.addf %19, %20 : vector<1x8x8xf32>
    %cst_14 = arith.constant dense<0xFF800000> : vector<1x8xf32>
    %22 = vector.multi_reduction <maximumf>, %21, %cst_14 [2] : vector<1x8x8xf32> to vector<1x8xf32>
    %23 = vector.shape_cast %22 : vector<1x8xf32> to vector<1x8x1xf32>
    %24 = vector.broadcast %23 : vector<1x8x1xf32> to vector<1x8x8xf32>
    %25 = arith.subf %21, %24 : vector<1x8x8xf32>
    %26 = math.exp %25 : vector<1x8x8xf32>
    %cst_15 = arith.constant dense<0.000000e+00> : vector<1x8xf32>
    %27 = vector.multi_reduction <add>, %26, %cst_15 [2] : vector<1x8x8xf32> to vector<1x8xf32>
    %28 = vector.shape_cast %27 : vector<1x8xf32> to vector<1x8x1xf32>
    %cst_16 = arith.constant 1.000000e+00 : f32
    %29 = vector.broadcast %cst_16 : f32 to vector<1x8x1xf32>
    %30 = arith.divf %29, %28 : vector<1x8x1xf32>
    %31 = vector.broadcast %30 : vector<1x8x1xf32> to vector<1x8x8xf32>
    %32 = arith.mulf %26, %31 : vector<1x8x8xf32>
    "tpu.trace_start"() <{level = 10 : i32, message = "bqk,bke->bqe"}> : () -> ()
    %cst_17 = arith.constant dense<0.000000e+00> : vector<1x8x8xf32>
    %33 = tpu.matmul %32, %16, %cst_17 {dimension_numbers = #tpu.dot_dimension_numbers<[2], [1], [1], [2], [0, 0, 0, 1, 1, 2], [0], [0]>} : vector<1x8x8xf32>, vector<1x8x8xf32>, vector<1x8x8xf32> -> vector<1x8x8xf32>
    "tpu.trace_stop"() : () -> ()
    %34 = vector.extract_strided_slice %7 {offsets = [0, 0, 8], sizes = [1, 8, 8], strides = [1, 1, 1]} : vector<1x8x96xf32> to vector<1x8x8xf32>
    %35 = vector.extract_strided_slice %7 {offsets = [0, 0, 40], sizes = [1, 8, 8], strides = [1, 1, 1]} : vector<1x8x96xf32> to vector<1x8x8xf32>
    %36 = vector.extract_strided_slice %7 {offsets = [0, 0, 72], sizes = [1, 8, 8], strides = [1, 1, 1]} : vector<1x8x96xf32> to vector<1x8x8xf32>
    "tpu.trace_start"() <{level = 10 : i32, message = "bqe,bke->bqk"}> : () -> ()
    %cst_18 = arith.constant dense<0.000000e+00> : vector<1x8x8xf32>
    %37 = tpu.matmul %34, %35, %cst_18 {dimension_numbers = #tpu.dot_dimension_numbers<[2], [2], [1], [1], [0, 0, 0, 1, 1, 1], [0], [0]>} : vector<1x8x8xf32>, vector<1x8x8xf32>, vector<1x8x8xf32> -> vector<1x8x8xf32>
    "tpu.trace_stop"() : () -> ()
    %cst_19 = arith.constant 0.353553385 : f32
    %38 = vector.broadcast %cst_19 : f32 to vector<1x8x8xf32>
    %39 = arith.mulf %37, %38 : vector<1x8x8xf32>
    %40 = vector.broadcast %13 : vector<1x1x8xf32> to vector<1x8x8xf32>
    %41 = arith.addf %39, %40 : vector<1x8x8xf32>
    %cst_20 = arith.constant dense<0xFF800000> : vector<1x8xf32>
    %42 = vector.multi_reduction <maximumf>, %41, %cst_20 [2] : vector<1x8x8xf32> to vector<1x8xf32>
    %43 = vector.shape_cast %42 : vector<1x8xf32> to vector<1x8x1xf32>
    %44 = vector.broadcast %43 : vector<1x8x1xf32> to vector<1x8x8xf32>
    %45 = arith.subf %41, %44 : vector<1x8x8xf32>
    %46 = math.exp %45 : vector<1x8x8xf32>
    %cst_21 = arith.constant dense<0.000000e+00> : vector<1x8xf32>
    %47 = vector.multi_reduction <add>, %46, %cst_21 [2] : vector<1x8x8xf32> to vector<1x8xf32>
    %48 = vector.shape_cast %47 : vector<1x8xf32> to vector<1x8x1xf32>
    %cst_22 = arith.constant 1.000000e+00 : f32
    %49 = vector.broadcast %cst_22 : f32 to vector<1x8x1xf32>
    %50 = arith.divf %49, %48 : vector<1x8x1xf32>
    %51 = vector.broadcast %50 : vector<1x8x1xf32> to vector<1x8x8xf32>
    %52 = arith.mulf %46, %51 : vector<1x8x8xf32>
    %53 = arith.addf %32, %52 : vector<1x8x8xf32>
    "tpu.trace_start"() <{level = 10 : i32, message = "bqk,bke->bqe"}> : () -> ()
    %cst_23 = arith.constant dense<0.000000e+00> : vector<1x8x8xf32>
    %54 = tpu.matmul %52, %36, %cst_23 {dimension_numbers = #tpu.dot_dimension_numbers<[2], [1], [1], [2], [0, 0, 0, 1, 1, 2], [0], [0]>} : vector<1x8x8xf32>, vector<1x8x8xf32>, vector<1x8x8xf32> -> vector<1x8x8xf32>
    "tpu.trace_stop"() : () -> ()
    %55 = vector.extract_strided_slice %7 {offsets = [0, 0, 16], sizes = [1, 8, 8], strides = [1, 1, 1]} : vector<1x8x96xf32> to vector<1x8x8xf32>
    %56 = vector.extract_strided_slice %7 {offsets = [0, 0, 48], sizes = [1, 8, 8], strides = [1, 1, 1]} : vector<1x8x96xf32> to vector<1x8x8xf32>
    %57 = vector.extract_strided_slice %7 {offsets = [0, 0, 80], sizes = [1, 8, 8], strides = [1, 1, 1]} : vector<1x8x96xf32> to vector<1x8x8xf32>
    "tpu.trace_start"() <{level = 10 : i32, message = "bqe,bke->bqk"}> : () -> ()
    %cst_24 = arith.constant dense<0.000000e+00> : vector<1x8x8xf32>
    %58 = tpu.matmul %55, %56, %cst_24 {dimension_numbers = #tpu.dot_dimension_numbers<[2], [2], [1], [1], [0, 0, 0, 1, 1, 1], [0], [0]>} : vector<1x8x8xf32>, vector<1x8x8xf32>, vector<1x8x8xf32> -> vector<1x8x8xf32>
    "tpu.trace_stop"() : () -> ()
    %cst_25 = arith.constant 0.353553385 : f32
    %59 = vector.broadcast %cst_25 : f32 to vector<1x8x8xf32>
    %60 = arith.mulf %58, %59 : vector<1x8x8xf32>
    %61 = vector.broadcast %13 : vector<1x1x8xf32> to vector<1x8x8xf32>
    %62 = arith.addf %60, %61 : vector<1x8x8xf32>
    %cst_26 = arith.constant dense<0xFF800000> : vector<1x8xf32>
    %63 = vector.multi_reduction <maximumf>, %62, %cst_26 [2] : vector<1x8x8xf32> to vector<1x8xf32>
    %64 = vector.shape_cast %63 : vector<1x8xf32> to vector<1x8x1xf32>
    %65 = vector.broadcast %64 : vector<1x8x1xf32> to vector<1x8x8xf32>
    %66 = arith.subf %62, %65 : vector<1x8x8xf32>
    %67 = math.exp %66 : vector<1x8x8xf32>
    %cst_27 = arith.constant dense<0.000000e+00> : vector<1x8xf32>
    %68 = vector.multi_reduction <add>, %67, %cst_27 [2] : vector<1x8x8xf32> to vector<1x8xf32>
    %69 = vector.shape_cast %68 : vector<1x8xf32> to vector<1x8x1xf32>
    %cst_28 = arith.constant 1.000000e+00 : f32
    %70 = vector.broadcast %cst_28 : f32 to vector<1x8x1xf32>
    %71 = arith.divf %70, %69 : vector<1x8x1xf32>
    %72 = vector.broadcast %71 : vector<1x8x1xf32> to vector<1x8x8xf32>
    %73 = arith.mulf %67, %72 : vector<1x8x8xf32>
    %74 = arith.addf %53, %73 : vector<1x8x8xf32>
    "tpu.trace_start"() <{level = 10 : i32, message = "bqk,bke->bqe"}> : () -> ()
    %cst_29 = arith.constant dense<0.000000e+00> : vector<1x8x8xf32>
    %75 = tpu.matmul %73, %57, %cst_29 {dimension_numbers = #tpu.dot_dimension_numbers<[2], [1], [1], [2], [0, 0, 0, 1, 1, 2], [0], [0]>} : vector<1x8x8xf32>, vector<1x8x8xf32>, vector<1x8x8xf32> -> vector<1x8x8xf32>
    "tpu.trace_stop"() : () -> ()
    %76 = vector.extract_strided_slice %7 {offsets = [0, 0, 24], sizes = [1, 8, 8], strides = [1, 1, 1]} : vector<1x8x96xf32> to vector<1x8x8xf32>
    %77 = vector.extract_strided_slice %7 {offsets = [0, 0, 56], sizes = [1, 8, 8], strides = [1, 1, 1]} : vector<1x8x96xf32> to vector<1x8x8xf32>
    %78 = vector.extract_strided_slice %7 {offsets = [0, 0, 88], sizes = [1, 8, 8], strides = [1, 1, 1]} : vector<1x8x96xf32> to vector<1x8x8xf32>
    "tpu.trace_start"() <{level = 10 : i32, message = "bqe,bke->bqk"}> : () -> ()
    %cst_30 = arith.constant dense<0.000000e+00> : vector<1x8x8xf32>
    %79 = tpu.matmul %76, %77, %cst_30 {dimension_numbers = #tpu.dot_dimension_numbers<[2], [2], [1], [1], [0, 0, 0, 1, 1, 1], [0], [0]>} : vector<1x8x8xf32>, vector<1x8x8xf32>, vector<1x8x8xf32> -> vector<1x8x8xf32>
    "tpu.trace_stop"() : () -> ()
    %cst_31 = arith.constant 0.353553385 : f32
    %80 = vector.broadcast %cst_31 : f32 to vector<1x8x8xf32>
    %81 = arith.mulf %79, %80 : vector<1x8x8xf32>
    %82 = vector.broadcast %13 : vector<1x1x8xf32> to vector<1x8x8xf32>
    %83 = arith.addf %81, %82 : vector<1x8x8xf32>
    %cst_32 = arith.constant dense<0xFF800000> : vector<1x8xf32>
    %84 = vector.multi_reduction <maximumf>, %83, %cst_32 [2] : vector<1x8x8xf32> to vector<1x8xf32>
    %85 = vector.shape_cast %84 : vector<1x8xf32> to vector<1x8x1xf32>
    %86 = vector.broadcast %85 : vector<1x8x1xf32> to vector<1x8x8xf32>
    %87 = arith.subf %83, %86 : vector<1x8x8xf32>
    %88 = math.exp %87 : vector<1x8x8xf32>
    %cst_33 = arith.constant dense<0.000000e+00> : vector<1x8xf32>
    %89 = vector.multi_reduction <add>, %88, %cst_33 [2] : vector<1x8x8xf32> to vector<1x8xf32>
    %90 = vector.shape_cast %89 : vector<1x8xf32> to vector<1x8x1xf32>
    %cst_34 = arith.constant 1.000000e+00 : f32
    %91 = vector.broadcast %cst_34 : f32 to vector<1x8x1xf32>
    %92 = arith.divf %91, %90 : vector<1x8x1xf32>
    %93 = vector.broadcast %92 : vector<1x8x1xf32> to vector<1x8x8xf32>
    %94 = arith.mulf %88, %93 : vector<1x8x8xf32>
    %95 = arith.addf %74, %94 : vector<1x8x8xf32>
    "tpu.trace_start"() <{level = 10 : i32, message = "bqk,bke->bqe"}> : () -> ()
    %cst_35 = arith.constant dense<0.000000e+00> : vector<1x8x8xf32>
    %96 = tpu.matmul %94, %78, %cst_35 {dimension_numbers = #tpu.dot_dimension_numbers<[2], [1], [1], [2], [0, 0, 0, 1, 1, 2], [0], [0]>} : vector<1x8x8xf32>, vector<1x8x8xf32>, vector<1x8x8xf32> -> vector<1x8x8xf32>
    "tpu.trace_stop"() : () -> ()
    %cst_36 = arith.constant 2.500000e-01 : f32
    %97 = vector.broadcast %cst_36 : f32 to vector<1x8x8xf32>
    %98 = arith.mulf %95, %97 : vector<1x8x8xf32>
    %99 = vector.shape_cast %98 : vector<1x8x8xf32> to vector<1x1x64xf32>
    %c0_37 = arith.constant 0 : index
    %c0_38 = arith.constant 0 : index
    %c0_39 = arith.constant 0 : index
    %100 = vector.load %arg10[%c0_37, %c0_38, %c0_39] : memref<1x1x64xf32, #tpu.memory_space<vmem>>, vector<1x1x64xf32>
    tpu.vector_store %arg10[%c0_37, %c0_38, %c0_39], %99 {strides = array<i32>} : memref<1x1x64xf32, #tpu.memory_space<vmem>>, vector<1x1x64xf32>,
    %101 = tpu.concatenate %33, %54, %75, %96 in 2 : vector<1x8x8xf32>, vector<1x8x8xf32>, vector<1x8x8xf32>, vector<1x8x8xf32> -> vector<1x8x32xf32>
    %102 = vector.shape_cast %101 : vector<1x8x32xf32> to vector<8x32xf32>
    %c0_40 = arith.constant 0 : index
    %c0_41 = arith.constant 0 : index
    %103 = vector.load %arg8[%c0_40, %c0_41] : memref<7x32xf32, #tpu.memory_space<vmem>>, vector<7x32xf32>
    %104 = vector.extract_strided_slice %103 {offsets = [0, 0], sizes = [1, 32], strides = [1, 1]} : vector<7x32xf32> to vector<1x32xf32>
    %105 = vector.extract_strided_slice %103 {offsets = [1, 0], sizes = [1, 32], strides = [1, 1]} : vector<7x32xf32> to vector<1x32xf32>
    %106 = vector.extract_strided_slice %103 {offsets = [2, 0], sizes = [1, 32], strides = [1, 1]} : vector<7x32xf32> to vector<1x32xf32>
    %107 = vector.extract_strided_slice %103 {offsets = [3, 0], sizes = [1, 32], strides = [1, 1]} : vector<7x32xf32> to vector<1x32xf32>
    %108 = vector.extract_strided_slice %103 {offsets = [4, 0], sizes = [1, 32], strides = [1, 1]} : vector<7x32xf32> to vector<1x32xf32>
    %109 = vector.extract_strided_slice %103 {offsets = [5, 0], sizes = [1, 32], strides = [1, 1]} : vector<7x32xf32> to vector<1x32xf32>
    %110 = vector.extract_strided_slice %103 {offsets = [6, 0], sizes = [1, 32], strides = [1, 1]} : vector<7x32xf32> to vector<1x32xf32>
    %c0_42 = arith.constant 0 : index
    %c0_43 = arith.constant 0 : index
    %111 = vector.load %arg5[%c0_42, %c0_43] : memref<32x32xf32, #tpu.memory_space<vmem>>, vector<32x32xf32>
    %cst_44 = arith.constant dense<0.000000e+00> : vector<8x32xf32>
    %112 = tpu.matmul %102, %111, %cst_44 {dimension_numbers = #tpu.dot_dimension_numbers<[1], [0], [0], [1], [0, 0, 1, 1], [], []>} : vector<8x32xf32>, vector<32x32xf32>, vector<8x32xf32> -> vector<8x32xf32>
    %113 = vector.broadcast %104 : vector<1x32xf32> to vector<8x32xf32>
    %114 = arith.addf %112, %113 : vector<8x32xf32>
    %115 = arith.addf %114, %1 : vector<8x32xf32>
    %cst_45 = arith.constant dense<0.000000e+00> : vector<8xf32>
    %116 = vector.multi_reduction <add>, %115, %cst_45 [1] : vector<8x32xf32> to vector<8xf32>
    %117 = vector.shape_cast %116 : vector<8xf32> to vector<8x1xf32>
    %cst_46 = arith.constant 3.200000e+01 : f32
    %118 = vector.broadcast %cst_46 : f32 to vector<8x1xf32>
    %119 = arith.divf %117, %118 : vector<8x1xf32>
    %120 = vector.broadcast %119 : vector<8x1xf32> to vector<8x32xf32>
    %121 = arith.subf %115, %120 : vector<8x32xf32>
    %122 = arith.mulf %121, %121 : vector<8x32xf32>
    %cst_47 = arith.constant dense<0.000000e+00> : vector<8xf32>
    %123 = vector.multi_reduction <add>, %122, %cst_47 [1] : vector<8x32xf32> to vector<8xf32>
    %124 = vector.shape_cast %123 : vector<8xf32> to vector<8x1xf32>
    %cst_48 = arith.constant 3.200000e+01 : f32
    %125 = vector.broadcast %cst_48 : f32 to vector<8x1xf32>
    %126 = arith.divf %124, %125 : vector<8x1xf32>
    %127 = vector.broadcast %119 : vector<8x1xf32> to vector<8x32xf32>
    %128 = arith.subf %115, %127 : vector<8x32xf32>
    %cst_49 = arith.constant 9.99999974E-6 : f32
    %129 = vector.broadcast %cst_49 : f32 to vector<8x1xf32>
    %130 = arith.addf %126, %129 : vector<8x1xf32>
    %131 = math.rsqrt %130 : vector<8x1xf32>
    %132 = vector.broadcast %131 : vector<8x1xf32> to vector<8x32xf32>
    %133 = arith.mulf %128, %132 : vector<8x32xf32>
    %134 = vector.broadcast %107 : vector<1x32xf32> to vector<8x32xf32>
    %135 = arith.mulf %133, %134 : vector<8x32xf32>
    %136 = vector.broadcast %108 : vector<1x32xf32> to vector<8x32xf32>
    %137 = arith.addf %135, %136 : vector<8x32xf32>
    %c0_50 = arith.constant 0 : index
    %c0_51 = arith.constant 0 : index
    %138 = vector.load %arg6[%c0_50, %c0_51] : memref<32x32xf32, #tpu.memory_space<vmem>>, vector<32x32xf32>
    %cst_52 = arith.constant dense<0.000000e+00> : vector<8x32xf32>
    %139 = tpu.matmul %137, %138, %cst_52 {dimension_numbers = #tpu.dot_dimension_numbers<[1], [0], [0], [1], [0, 0, 1, 1], [], []>} : vector<8x32xf32>, vector<32x32xf32>, vector<8x32xf32> -> vector<8x32xf32>
    %140 = vector.broadcast %105 : vector<1x32xf32> to vector<8x32xf32>
    %141 = arith.addf %139, %140 : vector<8x32xf32>
    %cst_53 = arith.constant 0.000000e+00 : f32
    %142 = vector.broadcast %cst_53 : f32 to vector<8x32xf32>
    %143 = arith.maximumf %141, %142 : vector<8x32xf32>
    %c0_54 = arith.constant 0 : index
    %c0_55 = arith.constant 0 : index
    %144 = vector.load %arg7[%c0_54, %c0_55] : memref<32x32xf32, #tpu.memory_space<vmem>>, vector<32x32xf32>
    %cst_56 = arith.constant dense<0.000000e+00> : vector<8x32xf32>
    %145 = tpu.matmul %143, %144, %cst_56 {dimension_numbers = #tpu.dot_dimension_numbers<[1], [0], [0], [1], [0, 0, 1, 1], [], []>} : vector<8x32xf32>, vector<32x32xf32>, vector<8x32xf32> -> vector<8x32xf32>
    %146 = vector.broadcast %106 : vector<1x32xf32> to vector<8x32xf32>
    %147 = arith.addf %145, %146 : vector<8x32xf32>
    %148 = arith.addf %147, %137 : vector<8x32xf32>
    %cst_57 = arith.constant dense<0.000000e+00> : vector<8xf32>
    %149 = vector.multi_reduction <add>, %148, %cst_57 [1] : vector<8x32xf32> to vector<8xf32>
    %150 = vector.shape_cast %149 : vector<8xf32> to vector<8x1xf32>
    %cst_58 = arith.constant 3.200000e+01 : f32
    %151 = vector.broadcast %cst_58 : f32 to vector<8x1xf32>
    %152 = arith.divf %150, %151 : vector<8x1xf32>
    %153 = vector.broadcast %152 : vector<8x1xf32> to vector<8x32xf32>
    %154 = arith.subf %148, %153 : vector<8x32xf32>
    %155 = arith.mulf %154, %154 : vector<8x32xf32>
    %cst_59 = arith.constant dense<0.000000e+00> : vector<8xf32>
    %156 = vector.multi_reduction <add>, %155, %cst_59 [1] : vector<8x32xf32> to vector<8xf32>
    %157 = vector.shape_cast %156 : vector<8xf32> to vector<8x1xf32>
    %cst_60 = arith.constant 3.200000e+01 : f32
    %158 = vector.broadcast %cst_60 : f32 to vector<8x1xf32>
    %159 = arith.divf %157, %158 : vector<8x1xf32>
    %160 = vector.broadcast %152 : vector<8x1xf32> to vector<8x32xf32>
    %161 = arith.subf %148, %160 : vector<8x32xf32>
    %cst_61 = arith.constant 9.99999974E-6 : f32
    %162 = vector.broadcast %cst_61 : f32 to vector<8x1xf32>
    %163 = arith.addf %159, %162 : vector<8x1xf32>
    %164 = math.rsqrt %163 : vector<8x1xf32>
    %165 = vector.broadcast %164 : vector<8x1xf32> to vector<8x32xf32>
    %166 = arith.mulf %161, %165 : vector<8x32xf32>
    %167 = vector.broadcast %109 : vector<1x32xf32> to vector<8x32xf32>
    %168 = arith.mulf %166, %167 : vector<8x32xf32>
    %169 = vector.broadcast %110 : vector<1x32xf32> to vector<8x32xf32>
    %170 = arith.addf %168, %169 : vector<8x32xf32>
    %171 = vector.shape_cast %170 : vector<8x32xf32> to vector<1x1x256xf32>
    %c0_62 = arith.constant 0 : index
    %c0_63 = arith.constant 0 : index
    %c0_64 = arith.constant 0 : index
    %172 = vector.load %arg9[%c0_62, %c0_63, %c0_64] : memref<1x1x256xf32, #tpu.memory_space<vmem>>, vector<1x1x256xf32>
    tpu.vector_store %arg9[%c0_62, %c0_63, %c0_64], %171 {strides = array<i32>} : memref<1x1x256xf32, #tpu.memory_space<vmem>>, vector<1x1x256xf32>,
    return
  }
  func.func @transform_0(%arg0: i32) -> (i32, i32, i32) {
    %c0_i32 = arith.constant 0 : i32
    %c0_i32_0 = arith.constant 0 : i32
    %c0_i32_1 = arith.constant 0 : i32
    return %arg0, %c0_i32, %c0_i32_0 : i32, i32, i32
  }
  func.func @transform_1(%arg0: i32) -> (i32, i32, i32) {
    %c0_i32 = arith.constant 0 : i32
    %c0_i32_0 = arith.constant 0 : i32
    %c0_i32_1 = arith.constant 0 : i32
    return %arg0, %c0_i32, %c0_i32_0 : i32, i32, i32
  }
  func.func @transform_2(%arg0: i32) -> (i32, i32) {
    %c0_i32 = arith.constant 0 : i32
    %c0_i32_0 = arith.constant 0 : i32
    %c0_i32_1 = arith.constant 0 : i32
    return %c0_i32, %c0_i32_0 : i32, i32
  }
  func.func @transform_3(%arg0: i32) -> (i32, i32) {
    %c0_i32 = arith.constant 0 : i32
    %c0_i32_0 = arith.constant 0 : i32
    %c0_i32_1 = arith.constant 0 : i32
    return %c0_i32, %c0_i32_0 : i32, i32
  }
  func.func @transform_4(%arg0: i32) -> (i32, i32) {
    %c0_i32 = arith.constant 0 : i32
    %c0_i32_0 = arith.constant 0 : i32
    %c0_i32_1 = arith.constant 0 : i32
    return %c0_i32, %c0_i32_0 : i32, i32
  }
  func.func @transform_5(%arg0: i32) -> (i32, i32) {
    %c0_i32 = arith.constant 0 : i32
    %c0_i32_0 = arith.constant 0 : i32
    %c0_i32_1 = arith.constant 0 : i32
    return %c0_i32, %c0_i32_0 : i32, i32
  }
  func.func @transform_6(%arg0: i32) -> (i32, i32) {
    %c0_i32 = arith.constant 0 : i32
    %c0_i32_0 = arith.constant 0 : i32
    %c0_i32_1 = arith.constant 0 : i32
    return %c0_i32, %c0_i32_0 : i32, i32
  }
  func.func @transform_7(%arg0: i32) -> (i32, i32) {
    %c0_i32 = arith.constant 0 : i32
    %c0_i32_0 = arith.constant 0 : i32
    %c0_i32_1 = arith.constant 0 : i32
    return %c0_i32, %c0_i32_0 : i32, i32
  }
  func.func @transform_8(%arg0: i32) -> (i32, i32, i32) {
    %c0_i32 = arith.constant 0 : i32
    %c0_i32_0 = arith.constant 0 : i32
    %c0_i32_1 = arith.constant 0 : i32
    return %arg0, %c0_i32, %c0_i32_0 : i32, i32, i32
  }
  func.func @transform_9(%arg0: i32) -> (i32, i32, i32) {
    %c0_i32 = arith.constant 0 : i32
    %c0_i32_0 = arith.constant 0 : i32
    %c0_i32_1 = arith.constant 0 : i32
    return %arg0, %c0_i32, %c0_i32_0 : i32, i32, i32
  }
}

module attributes {stable_mosaic.version = 11 : i64} {
  func.func @encoder_kernel(%arg0: i32, %arg1: memref<1x8x32xf32, #tpu.memory_space<vmem>>, %arg2: memref<1x1x8xf32, #tpu.memory_space<vmem>>, %arg3: memref<32x96xf32, #tpu.memory_space<vmem>>, %arg4: memref<1x96xf32, #tpu.memory_space<vmem>>, %arg5: memref<32x32xf32, #tpu.memory_space<vmem>>, %arg6: memref<32x32xf32, #tpu.memory_space<vmem>>, %arg7: memref<32x32xf32, #tpu.memory_space<vmem>>, %arg8: memref<7x32xf32, #tpu.memory_space<vmem>>, %arg9: memref<1x1x256xf32, #tpu.memory_space<vmem>>, %arg10: memref<1x1x64xf32, #tpu.memory_space<vmem>>) attributes {dimension_semantics = [#tpu.dimension_semantics<parallel>], iteration_bounds = array<i64: 2>, scalar_prefetch = 0 : i64, scratch_operands = 0 : i64, tpu.core_type = #tpu.core_type<tc>, window_params = [{transform_indices = @transform_0, window_bounds = array<i64: 1, 8, 32>}, {transform_indices = @transform_1, window_bounds = array<i64: 1, 1, 8>}, {pipeline_mode = #tpu.pipeline_mode<synchronous>, transform_indices = @transform_2, window_bounds = array<i64: 32, 96>}, {pipeline_mode = #tpu.pipeline_mode<synchronous>, transform_indices = @transform_3, window_bounds = array<i64: 1, 96>}, {pipeline_mode = #tpu.pipeline_mode<synchronous>, transform_indices = @transform_4, window_bounds = array<i64: 32, 32>}, {pipeline_mode = #tpu.pipeline_mode<synchronous>, transform_indices = @transform_5, window_bounds = array<i64: 32, 32>}, {pipeline_mode = #tpu.pipeline_mode<synchronous>, transform_indices = @transform_6, window_bounds = array<i64: 32, 32>}, {pipeline_mode = #tpu.pipeline_mode<synchronous>, transform_indices = @transform_7, window_bounds = array<i64: 7, 32>}, {transform_indices = @transform_8, window_bounds = array<i64: 1, 1, 256>}, {transform_indices = @transform_9, window_bounds = array<i64: 1, 1, 64>}]} {
    %c0 = arith.constant 0 : index
    %c0_0 = arith.constant 0 : index
    %c0_1 = arith.constant 0 : index
    %0 = vector.load %arg1[%c0, %c0_0, %c0_1] : memref<1x8x32xf32, #tpu.memory_space<vmem>>, vector<1x8x32xf32>
    %1 = vector.shape_cast %0 : vector<1x8x32xf32> to vector<8x32xf32>
    %c0_2 = arith.constant 0 : index
    %c0_3 = arith.constant 0 : index
    %2 = vector.load %arg3[%c0_2, %c0_3] : memref<32x96xf32, #tpu.memory_space<vmem>>, vector<32x96xf32>
    %cst = arith.constant dense<0.000000e+00> : vector<8x96xf32>
    %3 = tpu.matmul %1, %2, %cst {dimension_numbers = #tpu.dot_dimension_numbers<[1], [0], [0], [1], [0, 0, 1, 1], [], []>} : vector<8x32xf32>, vector<32x96xf32>, vector<8x96xf32> -> vector<8x96xf32>
    %c0_4 = arith.constant 0 : index
    %c0_5 = arith.constant 0 : index
    %4 = vector.load %arg4[%c0_4, %c0_5] : memref<1x96xf32, #tpu.memory_space<vmem>>, vector<1x96xf32>
    %5 = vector.broadcast %4 : vector<1x96xf32> to vector<8x96xf32>
    %6 = arith.addf %3, %5 : vector<8x96xf32>
    %7 = vector.shape_cast %6 : vector<8x96xf32> to vector<1x8x96xf32>
    %c0_6 = arith.constant 0 : index
    %c0_7 = arith.constant 0 : index
    %c0_8 = arith.constant 0 : index
    %8 = vector.load %arg2[%c0_6, %c0_7, %c0_8] : memref<1x1x8xf32, #tpu.memory_space<vmem>>, vector<1x1x8xf32>
    %cst_9 = arith.constant 0.000000e+00 : f32
    %9 = vector.broadcast %cst_9 : f32 to vector<1x1x8xf32>
    %10 = arith.cmpf oeq, %8, %9 : vector<1x1x8xf32>
    %cst_10 = arith.constant -1.000000e+30 : f32
    %cst_11 = arith.constant 0.000000e+00 : f32
    %11 = vector.broadcast %cst_10 : f32 to vector<1x1x8xf32>
    %12 = vector.broadcast %cst_11 : f32 to vector<1x1x8xf32>
    %13 = arith.select %10, %11, %12 : vector<1x1x8xi1>, vector<1x1x8xf32>
    %14 = vector.extract_strided_slice %7 {offsets = [0, 0, 0], sizes = [1, 8, 8], strides = [1, 1, 1]} : vector<1x8x96xf32> to vector<1x8x8xf32>
    %15 = vector.extract_strided_slice %7 {offsets = [0, 0, 32], sizes = [1, 8, 8], strides = [1, 1, 1]} : vector<1x8x96xf32> to vector<1x8x8xf32>
    %16 = vector.extract_strided_slice %7 {offsets = [0, 0, 64], sizes = [1, 8, 8], strides = [1, 1, 1]} : vector<1x8x96xf32> to vector<1x8x8xf32>
    "tpu.trace_start"() <{level = 10 : i32, message = "bqe,bke->bqk"}> : () -> ()
    %cst_12 = arith.constant dense<0.000000e+00> : vector<1x8x8xf32>
    %17 = tpu.matmul %14, %15, %cst_12 {dimension_numbers = #tpu.dot_dimension_numbers<[2], [2], [1], [1], [0, 0, 0, 1, 1, 1], [0], [0]>} : vector<1x8x8xf32>, vector<1x8x8xf32>, vector<1x8x8xf32> -> vector<1x8x8xf32>
    "tpu.trace_stop"() : () -> ()
    %cst_13 = arith.constant 0.353553385 : f32
    %18 = vector.broadcast %cst_13 : f32 to vector<1x8x8xf32>
    %19 = arith.mulf %17, %18 : vector<1x8x8xf32>
    %20 = vector.broadcast %13 : vector<1x1x8xf32> to vector<1x8x8xf32>
    %21 = arith.addf %19, %20 : vector<1x8x8xf32>
    %cst_14 = arith.constant dense<0xFF800000> : vector<1x8xf32>
    %22 = vector.multi_reduction <maximumf>, %21, %cst_14 [2] : vector<1x8x8xf32> to vector<1x8xf32>
    %23 = vector.shape_cast %22 : vector<1x8xf32> to vector<1x8x1xf32>
    %24 = vector.broadcast %23 : vector<1x8x1xf32> to vector<1x8x8xf32>
    %25 = arith.subf %21, %24 : vector<1x8x8xf32>
    %26 = math.exp %25 : vector<1x8x8xf32>
    %cst_15 = arith.constant dense<0.000000e+00> : vector<1x8xf32>
    %27 = vector.multi_reduction <add>, %26, %cst_15 [2] : vector<1x8x8xf32> to vector<1x8xf32>
    %28 = vector.shape_cast %27 : vector<1x8xf32> to vector<1x8x1xf32>
    %cst_16 = arith.constant 1.000000e+00 : f32
    %29 = vector.broadcast %cst_16 : f32 to vector<1x8x1xf32>
    %30 = arith.divf %29, %28 : vector<1x8x1xf32>
    %31 = vector.broadcast %30 : vector<1x8x1xf32> to vector<1x8x8xf32>
    %32 = arith.mulf %26, %31 : vector<1x8x8xf32>
    "tpu.trace_start"() <{level = 10 : i32, message = "bqk,bke->bqe"}> : () -> ()
    %cst_17 = arith.constant dense<0.000000e+00> : vector<1x8x8xf32>
    %33 = tpu.matmul %32, %16, %cst_17 {dimension_numbers = #tpu.dot_dimension_numbers<[2], [1], [1], [2], [0, 0, 0, 1, 1, 2], [0], [0]>} : vector<1x8x8xf32>, vector<1x8x8xf32>, vector<1x8x8xf32> -> vector<1x8x8xf32>
    "tpu.trace_stop"() : () -> ()
    %34 = vector.extract_strided_slice %7 {offsets = [0, 0, 8], sizes = [1, 8, 8], strides = [1, 1, 1]} : vector<1x8x96xf32> to vector<1x8x8xf32>
    %35 = vector.extract_strided_slice %7 {offsets = [0, 0, 40], sizes = [1, 8, 8], strides = [1, 1, 1]} : vector<1x8x96xf32> to vector<1x8x8xf32>
    %36 = vector.extract_strided_slice %7 {offsets = [0, 0, 72], sizes = [1, 8, 8], strides = [1, 1, 1]} : vector<1x8x96xf32> to vector<1x8x8xf32>
    "tpu.trace_start"() <{level = 10 : i32, message = "bqe,bke->bqk"}> : () -> ()
    %cst_18 = arith.constant dense<0.000000e+00> : vector<1x8x8xf32>
    %37 = tpu.matmul %34, %35, %cst_18 {dimension_numbers = #tpu.dot_dimension_numbers<[2], [2], [1], [1], [0, 0, 0, 1, 1, 1], [0], [0]>} : vector<1x8x8xf32>, vector<1x8x8xf32>, vector<1x8x8xf32> -> vector<1x8x8xf32>
    "tpu.trace_stop"() : () -> ()
    %cst_19 = arith.constant 0.353553385 : f32
    %38 = vector.broadcast %cst_19 : f32 to vector<1x8x8xf32>
    %39 = arith.mulf %37, %38 : vector<1x8x8xf32>
    %40 = vector.broadcast %13 : vector<1x1x8xf32> to vector<1x8x8xf32>
    %41 = arith.addf %39, %40 : vector<1x8x8xf32>
    %cst_20 = arith.constant dense<0xFF800000> : vector<1x8xf32>
    %42 = vector.multi_reduction <maximumf>, %41, %cst_20 [2] : vector<1x8x8xf32> to vector<1x8xf32>
    %43 = vector.shape_cast %42 : vector<1x8xf32> to vector<1x8x1xf32>
    %44 = vector.broadcast %43 : vector<1x8x1xf32> to vector<1x8x8xf32>
    %45 = arith.subf %41, %44 : vector<1x8x8xf32>
    %46 = math.exp %45 : vector<1x8x8xf32>
    %cst_21 = arith.constant dense<0.000000e+00> : vector<1x8xf32>
    %47 = vector.multi_reduction <add>, %46, %cst_21 [2] : vector<1x8x8xf32> to vector<1x8xf32>
    %48 = vector.shape_cast %47 : vector<1x8xf32> to vector<1x8x1xf32>
    %cst_22 = arith.constant 1.000000e+00 : f32
    %49 = vector.broadcast %cst_22 : f32 to vector<1x8x1xf32>
    %50 = arith.divf %49, %48 : vector<1x8x1xf32>
    %51 = vector.broadcast %50 : vector<1x8x1xf32> to vector<1x8x8xf32>
    %52 = arith.mulf %46, %51 : vector<1x8x8xf32>
    %53 = arith.addf %32, %52 : vector<1x8x8xf32>
    "tpu.trace_start"() <{level = 10 : i32, message = "bqk,bke->bqe"}> : () -> ()
    %cst_23 = arith.constant dense<0.000000e+00> : vector<1x8x8xf32>
    %54 = tpu.matmul %52, %36, %cst_23 {dimension_numbers = #tpu.dot_dimension_numbers<[2], [1], [1], [2], [0, 0, 0, 1, 1, 2], [0], [0]>} : vector<1x8x8xf32>, vector<1x8x8xf32>, vector<1x8x8xf32> -> vector<1x8x8xf32>
    "tpu.trace_stop"() : () -> ()
    %55 = vector.extract_strided_slice %7 {offsets = [0, 0, 16], sizes = [1, 8, 8], strides = [1, 1, 1]} : vector<1x8x96xf32> to vector<1x8x8xf32>
    %56 = vector.extract_strided_slice %7 {offsets = [0, 0, 48], sizes = [1, 8, 8], strides = [1, 1, 1]} : vector<1x8x96xf32> to vector<1x8x8xf32>
    %57 = vector.extract_strided_slice %7 {offsets = [0, 0, 80], sizes = [1, 8, 8], strides = [1, 1, 1]} : vector<1x8x96xf32> to vector<1x8x8xf32>
    "tpu.trace_start"() <{level = 10 : i32, message = "bqe,bke->bqk"}> : () -> ()
    %cst_24 = arith.constant dense<0.000000e+00> : vector<1x8x8xf32>
    %58 = tpu.matmul %55, %56, %cst_24 {dimension_numbers = #tpu.dot_dimension_numbers<[2], [2], [1], [1], [0, 0, 0, 1, 1, 1], [0], [0]>} : vector<1x8x8xf32>, vector<1x8x8xf32>, vector<1x8x8xf32> -> vector<1x8x8xf32>
    "tpu.trace_stop"() : () -> ()
    %cst_25 = arith.constant 0.353553385 : f32
    %59 = vector.broadcast %cst_25 : f32 to vector<1x8x8xf32>
    %60 = arith.mulf %58, %59 : vector<1x8x8xf32>
    %61 = vector.broadcast %13 : vector<1x1x8xf32> to vector<1x8x8xf32>
    %62 = arith.addf %60, %61 : vector<1x8x8xf32>
    %cst_26 = arith.constant dense<0xFF800000> : vector<1x8xf32>
    %63 = vector.multi_reduction <maximumf>, %62, %cst_26 [2] : vector<1x8x8xf32> to vector<1x8xf32>
    %64 = vector.shape_cast %63 : vector<1x8xf32> to vector<1x8x1xf32>
    %65 = vector.broadcast %64 : vector<1x8x1xf32> to vector<1x8x8xf32>
    %66 = arith.subf %62, %65 : vector<1x8x8xf32>
    %67 = math.exp %66 : vector<1x8x8xf32>
    %cst_27 = arith.constant dense<0.000000e+00> : vector<1x8xf32>
    %68 = vector.multi_reduction <add>, %67, %cst_27 [2] : vector<1x8x8xf32> to vector<1x8xf32>
    %69 = vector.shape_cast %68 : vector<1x8xf32> to vector<1x8x1xf32>
    %cst_28 = arith.constant 1.000000e+00 : f32
    %70 = vector.broadcast %cst_28 : f32 to vector<1x8x1xf32>
    %71 = arith.divf %70, %69 : vector<1x8x1xf32>
    %72 = vector.broadcast %71 : vector<1x8x1xf32> to vector<1x8x8xf32>
    %73 = arith.mulf %67, %72 : vector<1x8x8xf32>
    %74 = arith.addf %53, %73 : vector<1x8x8xf32>
    "tpu.trace_start"() <{level = 10 : i32, message = "bqk,bke->bqe"}> : () -> ()
    %cst_29 = arith.constant dense<0.000000e+00> : vector<1x8x8xf32>
    %75 = tpu.matmul %73, %57, %cst_29 {dimension_numbers = #tpu.dot_dimension_numbers<[2], [1], [1], [2], [0, 0, 0, 1, 1, 2], [0], [0]>} : vector<1x8x8xf32>, vector<1x8x8xf32>, vector<1x8x8xf32> -> vector<1x8x8xf32>
    "tpu.trace_stop"() : () -> ()
    %76 = vector.extract_strided_slice %7 {offsets = [0, 0, 24], sizes = [1, 8, 8], strides = [1, 1, 1]} : vector<1x8x96xf32> to vector<1x8x8xf32>
    %77 = vector.extract_strided_slice %7 {offsets = [0, 0, 56], sizes = [1, 8, 8], strides = [1, 1, 1]} : vector<1x8x96xf32> to vector<1x8x8xf32>
    %78 = vector.extract_strided_slice %7 {offsets = [0, 0, 88], sizes = [1, 8, 8], strides = [1, 1, 1]} : vector<1x8x96xf32> to vector<1x8x8xf32>
    "tpu.trace_start"() <{level = 10 : i32, message = "bqe,bke->bqk"}> : () -> ()
    %cst_30 = arith.constant dense<0.000000e+00> : vector<1x8x8xf32>
    %79 = tpu.matmul %76, %77, %cst_30 {dimension_numbers = #tpu.dot_dimension_numbers<[2], [2], [1], [1], [0, 0, 0, 1, 1, 1], [0], [0]>} : vector<1x8x8xf32>, vector<1x8x8xf32>, vector<1x8x8xf32> -> vector<1x8x8xf32>
    "tpu.trace_stop"() : () -> ()
    %cst_31 = arith.constant 0.353553385 : f32
    %80 = vector.broadcast %cst_31 : f32 to vector<1x8x8xf32>
    %81 = arith.mulf %79, %80 : vector<1x8x8xf32>
    %82 = vector.broadcast %13 : vector<1x1x8xf32> to vector<1x8x8xf32>
    %83 = arith.addf %81, %82 : vector<1x8x8xf32>
    %cst_32 = arith.constant dense<0xFF800000> : vector<1x8xf32>
    %84 = vector.multi_reduction <maximumf>, %83, %cst_32 [2] : vector<1x8x8xf32> to vector<1x8xf32>
    %85 = vector.shape_cast %84 : vector<1x8xf32> to vector<1x8x1xf32>
    %86 = vector.broadcast %85 : vector<1x8x1xf32> to vector<1x8x8xf32>
    %87 = arith.subf %83, %86 : vector<1x8x8xf32>
    %88 = math.exp %87 : vector<1x8x8xf32>
    %cst_33 = arith.constant dense<0.000000e+00> : vector<1x8xf32>
    %89 = vector.multi_reduction <add>, %88, %cst_33 [2] : vector<1x8x8xf32> to vector<1x8xf32>
    %90 = vector.shape_cast %89 : vector<1x8xf32> to vector<1x8x1xf32>
    %cst_34 = arith.constant 1.000000e+00 : f32
    %91 = vector.broadcast %cst_34 : f32 to vector<1x8x1xf32>
    %92 = arith.divf %91, %90 : vector<1x8x1xf32>
    %93 = vector.broadcast %92 : vector<1x8x1xf32> to vector<1x8x8xf32>
    %94 = arith.mulf %88, %93 : vector<1x8x8xf32>
    %95 = arith.addf %74, %94 : vector<1x8x8xf32>
    "tpu.trace_start"() <{level = 10 : i32, message = "bqk,bke->bqe"}> : () -> ()
    %cst_35 = arith.constant dense<0.000000e+00> : vector<1x8x8xf32>
    %96 = tpu.matmul %94, %78, %cst_35 {dimension_numbers = #tpu.dot_dimension_numbers<[2], [1], [1], [2], [0, 0, 0, 1, 1, 2], [0], [0]>} : vector<1x8x8xf32>, vector<1x8x8xf32>, vector<1x8x8xf32> -> vector<1x8x8xf32>
    "tpu.trace_stop"() : () -> ()
    %cst_36 = arith.constant 2.500000e-01 : f32
    %97 = vector.broadcast %cst_36 : f32 to vector<1x8x8xf32>
    %98 = arith.mulf %95, %97 : vector<1x8x8xf32>
    %99 = vector.shape_cast %98 : vector<1x8x8xf32> to vector<1x1x64xf32>
    %c0_37 = arith.constant 0 : index
    %c0_38 = arith.constant 0 : index
    %c0_39 = arith.constant 0 : index
    %100 = vector.load %arg10[%c0_37, %c0_38, %c0_39] : memref<1x1x64xf32, #tpu.memory_space<vmem>>, vector<1x1x64xf32>
    tpu.vector_store %arg10[%c0_37, %c0_38, %c0_39], %99 {strides = array<i32>} : memref<1x1x64xf32, #tpu.memory_space<vmem>>, vector<1x1x64xf32>,
    %101 = tpu.concatenate %33, %54, %75, %96 in 2 : vector<1x8x8xf32>, vector<1x8x8xf32>, vector<1x8x8xf32>, vector<1x8x8xf32> -> vector<1x8x32xf32>
    %102 = vector.shape_cast %101 : vector<1x8x32xf32> to vector<8x32xf32>
    %c0_40 = arith.constant 0 : index
    %c0_41 = arith.constant 0 : index
    %103 = vector.load %arg8[%c0_40, %c0_41] : memref<7x32xf32, #tpu.memory_space<vmem>>, vector<7x32xf32>
    %104 = vector.extract_strided_slice %103 {offsets = [0, 0], sizes = [1, 32], strides = [1, 1]} : vector<7x32xf32> to vector<1x32xf32>
    %105 = vector.extract_strided_slice %103 {offsets = [1, 0], sizes = [1, 32], strides = [1, 1]} : vector<7x32xf32> to vector<1x32xf32>
    %106 = vector.extract_strided_slice %103 {offsets = [2, 0], sizes = [1, 32], strides = [1, 1]} : vector<7x32xf32> to vector<1x32xf32>
    %107 = vector.extract_strided_slice %103 {offsets = [3, 0], sizes = [1, 32], strides = [1, 1]} : vector<7x32xf32> to vector<1x32xf32>
    %108 = vector.extract_strided_slice %103 {offsets = [4, 0], sizes = [1, 32], strides = [1, 1]} : vector<7x32xf32> to vector<1x32xf32>
    %109 = vector.extract_strided_slice %103 {offsets = [5, 0], sizes = [1, 32], strides = [1, 1]} : vector<7x32xf32> to vector<1x32xf32>
    %110 = vector.extract_strided_slice %103 {offsets = [6, 0], sizes = [1, 32], strides = [1, 1]} : vector<7x32xf32> to vector<1x32xf32>
    %c0_42 = arith.constant 0 : index
    %c0_43 = arith.constant 0 : index
    %111 = vector.load %arg5[%c0_42, %c0_43] : memref<32x32xf32, #tpu.memory_space<vmem>>, vector<32x32xf32>
    %cst_44 = arith.constant dense<0.000000e+00> : vector<8x32xf32>
    %112 = tpu.matmul %102, %111, %cst_44 {dimension_numbers = #tpu.dot_dimension_numbers<[1], [0], [0], [1], [0, 0, 1, 1], [], []>} : vector<8x32xf32>, vector<32x32xf32>, vector<8x32xf32> -> vector<8x32xf32>
    %113 = vector.broadcast %104 : vector<1x32xf32> to vector<8x32xf32>
    %114 = arith.addf %112, %113 : vector<8x32xf32>
    %115 = arith.addf %114, %1 : vector<8x32xf32>
    %cst_45 = arith.constant dense<0.000000e+00> : vector<8xf32>
    %116 = vector.multi_reduction <add>, %115, %cst_45 [1] : vector<8x32xf32> to vector<8xf32>
    %117 = vector.shape_cast %116 : vector<8xf32> to vector<8x1xf32>
    %cst_46 = arith.constant 3.200000e+01 : f32
    %118 = vector.broadcast %cst_46 : f32 to vector<8x1xf32>
    %119 = arith.divf %117, %118 : vector<8x1xf32>
    %120 = vector.broadcast %119 : vector<8x1xf32> to vector<8x32xf32>
    %121 = arith.subf %115, %120 : vector<8x32xf32>
    %122 = arith.mulf %121, %121 : vector<8x32xf32>
    %cst_47 = arith.constant dense<0.000000e+00> : vector<8xf32>
    %123 = vector.multi_reduction <add>, %122, %cst_47 [1] : vector<8x32xf32> to vector<8xf32>
    %124 = vector.shape_cast %123 : vector<8xf32> to vector<8x1xf32>
    %cst_48 = arith.constant 3.200000e+01 : f32
    %125 = vector.broadcast %cst_48 : f32 to vector<8x1xf32>
    %126 = arith.divf %124, %125 : vector<8x1xf32>
    %127 = vector.broadcast %119 : vector<8x1xf32> to vector<8x32xf32>
    %128 = arith.subf %115, %127 : vector<8x32xf32>
    %cst_49 = arith.constant 9.99999974E-6 : f32
    %129 = vector.broadcast %cst_49 : f32 to vector<8x1xf32>
    %130 = arith.addf %126, %129 : vector<8x1xf32>
    %131 = math.rsqrt %130 : vector<8x1xf32>
    %132 = vector.broadcast %131 : vector<8x1xf32> to vector<8x32xf32>
    %133 = arith.mulf %128, %132 : vector<8x32xf32>
    %134 = vector.broadcast %107 : vector<1x32xf32> to vector<8x32xf32>
    %135 = arith.mulf %133, %134 : vector<8x32xf32>
    %136 = vector.broadcast %108 : vector<1x32xf32> to vector<8x32xf32>
    %137 = arith.addf %135, %136 : vector<8x32xf32>
    %c0_50 = arith.constant 0 : index
    %c0_51 = arith.constant 0 : index
    %138 = vector.load %arg6[%c0_50, %c0_51] : memref<32x32xf32, #tpu.memory_space<vmem>>, vector<32x32xf32>
    %cst_52 = arith.constant dense<0.000000e+00> : vector<8x32xf32>
    %139 = tpu.matmul %137, %138, %cst_52 {dimension_numbers = #tpu.dot_dimension_numbers<[1], [0], [0], [1], [0, 0, 1, 1], [], []>} : vector<8x32xf32>, vector<32x32xf32>, vector<8x32xf32> -> vector<8x32xf32>
    %140 = vector.broadcast %105 : vector<1x32xf32> to vector<8x32xf32>
    %141 = arith.addf %139, %140 : vector<8x32xf32>
    %cst_53 = arith.constant 0.000000e+00 : f32
    %142 = vector.broadcast %cst_53 : f32 to vector<8x32xf32>
    %143 = arith.maximumf %141, %142 : vector<8x32xf32>
    %c0_54 = arith.constant 0 : index
    %c0_55 = arith.constant 0 : index
    %144 = vector.load %arg7[%c0_54, %c0_55] : memref<32x32xf32, #tpu.memory_space<vmem>>, vector<32x32xf32>
    %cst_56 = arith.constant dense<0.000000e+00> : vector<8x32xf32>
    %145 = tpu.matmul %143, %144, %cst_56 {dimension_numbers = #tpu.dot_dimension_numbers<[1], [0], [0], [1], [0, 0, 1, 1], [], []>} : vector<8x32xf32>, vector<32x32xf32>, vector<8x32xf32> -> vector<8x32xf32>
    %146 = vector.broadcast %106 : vector<1x32xf32> to vector<8x32xf32>
    %147 = arith.addf %145, %146 : vector<8x32xf32>
    %148 = arith.addf %147, %137 : vector<8x32xf32>
    %cst_57 = arith.constant dense<0.000000e+00> : vector<8xf32>
    %149 = vector.multi_reduction <add>, %148, %cst_57 [1] : vector<8x32xf32> to vector<8xf32>
    %150 = vector.shape_cast %149 : vector<8xf32> to vector<8x1xf32>
    %cst_58 = arith.constant 3.200000e+01 : f32
    %151 = vector.broadcast %cst_58 : f32 to vector<8x1xf32>
    %152 = arith.divf %150, %151 : vector<8x1xf32>
    %153 = vector.broadcast %152 : vector<8x1xf32> to vector<8x32xf32>
    %154 = arith.subf %148, %153 : vector<8x32xf32>
    %155 = arith.mulf %154, %154 : vector<8x32xf32>
    %cst_59 = arith.constant dense<0.000000e+00> : vector<8xf32>
    %156 = vector.multi_reduction <add>, %155, %cst_59 [1] : vector<8x32xf32> to vector<8xf32>
    %157 = vector.shape_cast %156 : vector<8xf32> to vector<8x1xf32>
    %cst_60 = arith.constant 3.200000e+01 : f32
    %158 = vector.broadcast %cst_60 : f32 to vector<8x1xf32>
    %159 = arith.divf %157, %158 : vector<8x1xf32>
    %160 = vector.broadcast %152 : vector<8x1xf32> to vector<8x32xf32>
    %161 = arith.subf %148, %160 : vector<8x32xf32>
    %cst_61 = arith.constant 9.99999974E-6 : f32
    %162 = vector.broadcast %cst_61 : f32 to vector<8x1xf32>
    %163 = arith.addf %159, %162 : vector<8x1xf32>
    %164 = math.rsqrt %163 : vector<8x1xf32>
    %165 = vector.broadcast %164 : vector<8x1xf32> to vector<8x32xf32>
    %166 = arith.mulf %161, %165 : vector<8x32xf32>
    %167 = vector.broadcast %109 : vector<1x32xf32> to vector<8x32xf32>
    %168 = arith.mulf %166, %167 : vector<8x32xf32>
    %169 = vector.broadcast %110 : vector<1x32xf32> to vector<8x32xf32>
    %170 = arith.addf %168, %169 : vector<8x32xf32>
    %171 = vector.shape_cast %170 : vector<8x32xf32> to vector<1x1x256xf32>
    %c0_62 = arith.constant 0 : index
    %c0_63 = arith.constant 0 : index
    %c0_64 = arith.constant 0 : index
    %172 = vector.load %arg9[%c0_62, %c0_63, %c0_64] : memref<1x1x256xf32, #tpu.memory_space<vmem>>, vector<1x1x256xf32>
    tpu.vector_store %arg9[%c0_62, %c0_63, %c0_64], %171 {strides = array<i32>} : memref<1x1x256xf32, #tpu.memory_space<vmem>>, vector<1x1x256xf32>,
    return
  }
  func.func @transform_0(%arg0: i32) -> (i32, i32, i32) {
    %c0_i32 = arith.constant 0 : i32
    %c0_i32_0 = arith.constant 0 : i32
    %c0_i32_1 = arith.constant 0 : i32
    return %arg0, %c0_i32, %c0_i32_0 : i32, i32, i32
  }
  func.func @transform_1(%arg0: i32) -> (i32, i32, i32) {
    %c0_i32 = arith.constant 0 : i32
    %c0_i32_0 = arith.constant 0 : i32
    %c0_i32_1 = arith.constant 0 : i32
    return %arg0, %c0_i32, %c0_i32_0 : i32, i32, i32
  }
  func.func @transform_2(%arg0: i32) -> (i32, i32) {
    %c0_i32 = arith.constant 0 : i32
    %c0_i32_0 = arith.constant 0 : i32
    %c0_i32_1 = arith.constant 0 : i32
    return %c0_i32, %c0_i32_0 : i32, i32
  }
  func.func @transform_3(%arg0: i32) -> (i32, i32) {
    %c0_i32 = arith.constant 0 : i32
    %c0_i32_0 = arith.constant 0 : i32
    %c0_i32_1 = arith.constant 0 : i32
    return %c0_i32, %c0_i32_0 : i32, i32
  }
  func.func @transform_4(%arg0: i32) -> (i32, i32) {
    %c0_i32 = arith.constant 0 : i32
    %c0_i32_0 = arith.constant 0 : i32
    %c0_i32_1 = arith.constant 0 : i32
    return %c0_i32, %c0_i32_0 : i32, i32
  }
  func.func @transform_5(%arg0: i32) -> (i32, i32) {
    %c0_i32 = arith.constant 0 : i32
    %c0_i32_0 = arith.constant 0 : i32
    %c0_i32_1 = arith.constant 0 : i32
    return %c0_i32, %c0_i32_0 : i32, i32
  }
  func.func @transform_6(%arg0: i32) -> (i32, i32) {
    %c0_i32 = arith.constant 0 : i32
    %c0_i32_0 = arith.constant 0 : i32
    %c0_i32_1 = arith.constant 0 : i32
    return %c0_i32, %c0_i32_0 : i32, i32
  }
  func.func @transform_7(%arg0: i32) -> (i32, i32) {
    %c0_i32 = arith.constant 0 : i32
    %c0_i32_0 = arith.constant 0 : i32
    %c0_i32_1 = arith.constant 0 : i32
    return %c0_i32, %c0_i32_0 : i32, i32
  }
  func.func @transform_8(%arg0: i32) -> (i32, i32, i32) {
    %c0_i32 = arith.constant 0 : i32
    %c0_i32_0 = arith.constant 0 : i32
    %c0_i32_1 = arith.constant 0 : i32
    return %arg0, %c0_i32, %c0_i32_0 : i32, i32, i32
  }
  func.func @transform_9(%arg0: i32) -> (i32, i32, i32) {
    %c0_i32 = arith.constant 0 : i32
    %c0_i32_0 = arith.constant 0 : i32
    %c0_i32_1 = arith.constant 0 : i32
    return %arg0, %c0_i32, %c0_i32_0 : i32, i32, i32
  }
}

module attributes {stable_mosaic.version = 11 : i64} {
  func.func @encoder_kernel(%arg0: i32, %arg1: memref<1x8x32xf32, #tpu.memory_space<vmem>>, %arg2: memref<1x1x8xf32, #tpu.memory_space<vmem>>, %arg3: memref<32x96xf32, #tpu.memory_space<vmem>>, %arg4: memref<1x96xf32, #tpu.memory_space<vmem>>, %arg5: memref<32x32xf32, #tpu.memory_space<vmem>>, %arg6: memref<32x32xf32, #tpu.memory_space<vmem>>, %arg7: memref<32x32xf32, #tpu.memory_space<vmem>>, %arg8: memref<7x32xf32, #tpu.memory_space<vmem>>, %arg9: memref<1x8x32xf32, #tpu.memory_space<vmem>>, %arg10: memref<1x8x8xf32, #tpu.memory_space<vmem>>) attributes {dimension_semantics = [#tpu.dimension_semantics<parallel>], iteration_bounds = array<i64: 2>, scalar_prefetch = 0 : i64, scratch_operands = 0 : i64, tpu.core_type = #tpu.core_type<tc>, window_params = [{transform_indices = @transform_0, window_bounds = array<i64: 1, 8, 32>}, {transform_indices = @transform_1, window_bounds = array<i64: 1, 1, 8>}, {pipeline_mode = #tpu.pipeline_mode<synchronous>, transform_indices = @transform_2, window_bounds = array<i64: 32, 96>}, {pipeline_mode = #tpu.pipeline_mode<synchronous>, transform_indices = @transform_3, window_bounds = array<i64: 1, 96>}, {pipeline_mode = #tpu.pipeline_mode<synchronous>, transform_indices = @transform_4, window_bounds = array<i64: 32, 32>}, {pipeline_mode = #tpu.pipeline_mode<synchronous>, transform_indices = @transform_5, window_bounds = array<i64: 32, 32>}, {pipeline_mode = #tpu.pipeline_mode<synchronous>, transform_indices = @transform_6, window_bounds = array<i64: 32, 32>}, {pipeline_mode = #tpu.pipeline_mode<synchronous>, transform_indices = @transform_7, window_bounds = array<i64: 7, 32>}, {transform_indices = @transform_8, window_bounds = array<i64: 1, 8, 32>}, {transform_indices = @transform_9, window_bounds = array<i64: 1, 8, 8>}]} {
    %c0 = arith.constant 0 : index
    %c0_0 = arith.constant 0 : index
    %c0_1 = arith.constant 0 : index
    %0 = vector.load %arg1[%c0, %c0_0, %c0_1] : memref<1x8x32xf32, #tpu.memory_space<vmem>>, vector<1x8x32xf32>
    %1 = vector.shape_cast %0 : vector<1x8x32xf32> to vector<8x32xf32>
    %c0_2 = arith.constant 0 : index
    %c0_3 = arith.constant 0 : index
    %2 = vector.load %arg3[%c0_2, %c0_3] : memref<32x96xf32, #tpu.memory_space<vmem>>, vector<32x96xf32>
    %cst = arith.constant dense<0.000000e+00> : vector<8x96xf32>
    %3 = tpu.matmul %1, %2, %cst {dimension_numbers = #tpu.dot_dimension_numbers<[1], [0], [0], [1], [0, 0, 1, 1], [], []>} : vector<8x32xf32>, vector<32x96xf32>, vector<8x96xf32> -> vector<8x96xf32>
    %c0_4 = arith.constant 0 : index
    %c0_5 = arith.constant 0 : index
    %4 = vector.load %arg4[%c0_4, %c0_5] : memref<1x96xf32, #tpu.memory_space<vmem>>, vector<1x96xf32>
    %5 = vector.broadcast %4 : vector<1x96xf32> to vector<8x96xf32>
    %6 = arith.addf %3, %5 : vector<8x96xf32>
    %7 = vector.shape_cast %6 : vector<8x96xf32> to vector<1x8x96xf32>
    %c0_6 = arith.constant 0 : index
    %c0_7 = arith.constant 0 : index
    %c0_8 = arith.constant 0 : index
    %8 = vector.load %arg2[%c0_6, %c0_7, %c0_8] : memref<1x1x8xf32, #tpu.memory_space<vmem>>, vector<1x1x8xf32>
    %cst_9 = arith.constant 0.000000e+00 : f32
    %9 = vector.broadcast %cst_9 : f32 to vector<1x1x8xf32>
    %10 = arith.cmpf oeq, %8, %9 : vector<1x1x8xf32>
    %cst_10 = arith.constant -1.000000e+30 : f32
    %cst_11 = arith.constant 0.000000e+00 : f32
    %11 = vector.broadcast %cst_10 : f32 to vector<1x1x8xf32>
    %12 = vector.broadcast %cst_11 : f32 to vector<1x1x8xf32>
    %13 = arith.select %10, %11, %12 : vector<1x1x8xi1>, vector<1x1x8xf32>
    %14 = vector.extract_strided_slice %7 {offsets = [0, 0, 0], sizes = [1, 8, 8], strides = [1, 1, 1]} : vector<1x8x96xf32> to vector<1x8x8xf32>
    %15 = vector.extract_strided_slice %7 {offsets = [0, 0, 32], sizes = [1, 8, 8], strides = [1, 1, 1]} : vector<1x8x96xf32> to vector<1x8x8xf32>
    %16 = vector.extract_strided_slice %7 {offsets = [0, 0, 64], sizes = [1, 8, 8], strides = [1, 1, 1]} : vector<1x8x96xf32> to vector<1x8x8xf32>
    "tpu.trace_start"() <{level = 10 : i32, message = "bqe,bke->bqk"}> : () -> ()
    %cst_12 = arith.constant dense<0.000000e+00> : vector<1x8x8xf32>
    %17 = tpu.matmul %14, %15, %cst_12 {dimension_numbers = #tpu.dot_dimension_numbers<[2], [2], [1], [1], [0, 0, 0, 1, 1, 1], [0], [0]>} : vector<1x8x8xf32>, vector<1x8x8xf32>, vector<1x8x8xf32> -> vector<1x8x8xf32>
    "tpu.trace_stop"() : () -> ()
    %cst_13 = arith.constant 0.353553385 : f32
    %18 = vector.broadcast %cst_13 : f32 to vector<1x8x8xf32>
    %19 = arith.mulf %17, %18 : vector<1x8x8xf32>
    %20 = vector.broadcast %13 : vector<1x1x8xf32> to vector<1x8x8xf32>
    %21 = arith.addf %19, %20 : vector<1x8x8xf32>
    %cst_14 = arith.constant dense<0xFF800000> : vector<1x8xf32>
    %22 = vector.multi_reduction <maximumf>, %21, %cst_14 [2] : vector<1x8x8xf32> to vector<1x8xf32>
    %23 = vector.shape_cast %22 : vector<1x8xf32> to vector<1x8x1xf32>
    %24 = vector.broadcast %23 : vector<1x8x1xf32> to vector<1x8x8xf32>
    %25 = arith.subf %21, %24 : vector<1x8x8xf32>
    %26 = math.exp %25 : vector<1x8x8xf32>
    %cst_15 = arith.constant dense<0.000000e+00> : vector<1x8xf32>
    %27 = vector.multi_reduction <add>, %26, %cst_15 [2] : vector<1x8x8xf32> to vector<1x8xf32>
    %28 = vector.shape_cast %27 : vector<1x8xf32> to vector<1x8x1xf32>
    %cst_16 = arith.constant 1.000000e+00 : f32
    %29 = vector.broadcast %cst_16 : f32 to vector<1x8x1xf32>
    %30 = arith.divf %29, %28 : vector<1x8x1xf32>
    %31 = vector.broadcast %30 : vector<1x8x1xf32> to vector<1x8x8xf32>
    %32 = arith.mulf %26, %31 : vector<1x8x8xf32>
    "tpu.trace_start"() <{level = 10 : i32, message = "bqk,bke->bqe"}> : () -> ()
    %cst_17 = arith.constant dense<0.000000e+00> : vector<1x8x8xf32>
    %33 = tpu.matmul %32, %16, %cst_17 {dimension_numbers = #tpu.dot_dimension_numbers<[2], [1], [1], [2], [0, 0, 0, 1, 1, 2], [0], [0]>} : vector<1x8x8xf32>, vector<1x8x8xf32>, vector<1x8x8xf32> -> vector<1x8x8xf32>
    "tpu.trace_stop"() : () -> ()
    %34 = vector.extract_strided_slice %7 {offsets = [0, 0, 8], sizes = [1, 8, 8], strides = [1, 1, 1]} : vector<1x8x96xf32> to vector<1x8x8xf32>
    %35 = vector.extract_strided_slice %7 {offsets = [0, 0, 40], sizes = [1, 8, 8], strides = [1, 1, 1]} : vector<1x8x96xf32> to vector<1x8x8xf32>
    %36 = vector.extract_strided_slice %7 {offsets = [0, 0, 72], sizes = [1, 8, 8], strides = [1, 1, 1]} : vector<1x8x96xf32> to vector<1x8x8xf32>
    "tpu.trace_start"() <{level = 10 : i32, message = "bqe,bke->bqk"}> : () -> ()
    %cst_18 = arith.constant dense<0.000000e+00> : vector<1x8x8xf32>
    %37 = tpu.matmul %34, %35, %cst_18 {dimension_numbers = #tpu.dot_dimension_numbers<[2], [2], [1], [1], [0, 0, 0, 1, 1, 1], [0], [0]>} : vector<1x8x8xf32>, vector<1x8x8xf32>, vector<1x8x8xf32> -> vector<1x8x8xf32>
    "tpu.trace_stop"() : () -> ()
    %cst_19 = arith.constant 0.353553385 : f32
    %38 = vector.broadcast %cst_19 : f32 to vector<1x8x8xf32>
    %39 = arith.mulf %37, %38 : vector<1x8x8xf32>
    %40 = vector.broadcast %13 : vector<1x1x8xf32> to vector<1x8x8xf32>
    %41 = arith.addf %39, %40 : vector<1x8x8xf32>
    %cst_20 = arith.constant dense<0xFF800000> : vector<1x8xf32>
    %42 = vector.multi_reduction <maximumf>, %41, %cst_20 [2] : vector<1x8x8xf32> to vector<1x8xf32>
    %43 = vector.shape_cast %42 : vector<1x8xf32> to vector<1x8x1xf32>
    %44 = vector.broadcast %43 : vector<1x8x1xf32> to vector<1x8x8xf32>
    %45 = arith.subf %41, %44 : vector<1x8x8xf32>
    %46 = math.exp %45 : vector<1x8x8xf32>
    %cst_21 = arith.constant dense<0.000000e+00> : vector<1x8xf32>
    %47 = vector.multi_reduction <add>, %46, %cst_21 [2] : vector<1x8x8xf32> to vector<1x8xf32>
    %48 = vector.shape_cast %47 : vector<1x8xf32> to vector<1x8x1xf32>
    %cst_22 = arith.constant 1.000000e+00 : f32
    %49 = vector.broadcast %cst_22 : f32 to vector<1x8x1xf32>
    %50 = arith.divf %49, %48 : vector<1x8x1xf32>
    %51 = vector.broadcast %50 : vector<1x8x1xf32> to vector<1x8x8xf32>
    %52 = arith.mulf %46, %51 : vector<1x8x8xf32>
    %53 = arith.addf %32, %52 : vector<1x8x8xf32>
    "tpu.trace_start"() <{level = 10 : i32, message = "bqk,bke->bqe"}> : () -> ()
    %cst_23 = arith.constant dense<0.000000e+00> : vector<1x8x8xf32>
    %54 = tpu.matmul %52, %36, %cst_23 {dimension_numbers = #tpu.dot_dimension_numbers<[2], [1], [1], [2], [0, 0, 0, 1, 1, 2], [0], [0]>} : vector<1x8x8xf32>, vector<1x8x8xf32>, vector<1x8x8xf32> -> vector<1x8x8xf32>
    "tpu.trace_stop"() : () -> ()
    %55 = vector.extract_strided_slice %7 {offsets = [0, 0, 16], sizes = [1, 8, 8], strides = [1, 1, 1]} : vector<1x8x96xf32> to vector<1x8x8xf32>
    %56 = vector.extract_strided_slice %7 {offsets = [0, 0, 48], sizes = [1, 8, 8], strides = [1, 1, 1]} : vector<1x8x96xf32> to vector<1x8x8xf32>
    %57 = vector.extract_strided_slice %7 {offsets = [0, 0, 80], sizes = [1, 8, 8], strides = [1, 1, 1]} : vector<1x8x96xf32> to vector<1x8x8xf32>
    "tpu.trace_start"() <{level = 10 : i32, message = "bqe,bke->bqk"}> : () -> ()
    %cst_24 = arith.constant dense<0.000000e+00> : vector<1x8x8xf32>
    %58 = tpu.matmul %55, %56, %cst_24 {dimension_numbers = #tpu.dot_dimension_numbers<[2], [2], [1], [1], [0, 0, 0, 1, 1, 1], [0], [0]>} : vector<1x8x8xf32>, vector<1x8x8xf32>, vector<1x8x8xf32> -> vector<1x8x8xf32>
    "tpu.trace_stop"() : () -> ()
    %cst_25 = arith.constant 0.353553385 : f32
    %59 = vector.broadcast %cst_25 : f32 to vector<1x8x8xf32>
    %60 = arith.mulf %58, %59 : vector<1x8x8xf32>
    %61 = vector.broadcast %13 : vector<1x1x8xf32> to vector<1x8x8xf32>
    %62 = arith.addf %60, %61 : vector<1x8x8xf32>
    %cst_26 = arith.constant dense<0xFF800000> : vector<1x8xf32>
    %63 = vector.multi_reduction <maximumf>, %62, %cst_26 [2] : vector<1x8x8xf32> to vector<1x8xf32>
    %64 = vector.shape_cast %63 : vector<1x8xf32> to vector<1x8x1xf32>
    %65 = vector.broadcast %64 : vector<1x8x1xf32> to vector<1x8x8xf32>
    %66 = arith.subf %62, %65 : vector<1x8x8xf32>
    %67 = math.exp %66 : vector<1x8x8xf32>
    %cst_27 = arith.constant dense<0.000000e+00> : vector<1x8xf32>
    %68 = vector.multi_reduction <add>, %67, %cst_27 [2] : vector<1x8x8xf32> to vector<1x8xf32>
    %69 = vector.shape_cast %68 : vector<1x8xf32> to vector<1x8x1xf32>
    %cst_28 = arith.constant 1.000000e+00 : f32
    %70 = vector.broadcast %cst_28 : f32 to vector<1x8x1xf32>
    %71 = arith.divf %70, %69 : vector<1x8x1xf32>
    %72 = vector.broadcast %71 : vector<1x8x1xf32> to vector<1x8x8xf32>
    %73 = arith.mulf %67, %72 : vector<1x8x8xf32>
    %74 = arith.addf %53, %73 : vector<1x8x8xf32>
    "tpu.trace_start"() <{level = 10 : i32, message = "bqk,bke->bqe"}> : () -> ()
    %cst_29 = arith.constant dense<0.000000e+00> : vector<1x8x8xf32>
    %75 = tpu.matmul %73, %57, %cst_29 {dimension_numbers = #tpu.dot_dimension_numbers<[2], [1], [1], [2], [0, 0, 0, 1, 1, 2], [0], [0]>} : vector<1x8x8xf32>, vector<1x8x8xf32>, vector<1x8x8xf32> -> vector<1x8x8xf32>
    "tpu.trace_stop"() : () -> ()
    %76 = vector.extract_strided_slice %7 {offsets = [0, 0, 24], sizes = [1, 8, 8], strides = [1, 1, 1]} : vector<1x8x96xf32> to vector<1x8x8xf32>
    %77 = vector.extract_strided_slice %7 {offsets = [0, 0, 56], sizes = [1, 8, 8], strides = [1, 1, 1]} : vector<1x8x96xf32> to vector<1x8x8xf32>
    %78 = vector.extract_strided_slice %7 {offsets = [0, 0, 88], sizes = [1, 8, 8], strides = [1, 1, 1]} : vector<1x8x96xf32> to vector<1x8x8xf32>
    "tpu.trace_start"() <{level = 10 : i32, message = "bqe,bke->bqk"}> : () -> ()
    %cst_30 = arith.constant dense<0.000000e+00> : vector<1x8x8xf32>
    %79 = tpu.matmul %76, %77, %cst_30 {dimension_numbers = #tpu.dot_dimension_numbers<[2], [2], [1], [1], [0, 0, 0, 1, 1, 1], [0], [0]>} : vector<1x8x8xf32>, vector<1x8x8xf32>, vector<1x8x8xf32> -> vector<1x8x8xf32>
    "tpu.trace_stop"() : () -> ()
    %cst_31 = arith.constant 0.353553385 : f32
    %80 = vector.broadcast %cst_31 : f32 to vector<1x8x8xf32>
    %81 = arith.mulf %79, %80 : vector<1x8x8xf32>
    %82 = vector.broadcast %13 : vector<1x1x8xf32> to vector<1x8x8xf32>
    %83 = arith.addf %81, %82 : vector<1x8x8xf32>
    %cst_32 = arith.constant dense<0xFF800000> : vector<1x8xf32>
    %84 = vector.multi_reduction <maximumf>, %83, %cst_32 [2] : vector<1x8x8xf32> to vector<1x8xf32>
    %85 = vector.shape_cast %84 : vector<1x8xf32> to vector<1x8x1xf32>
    %86 = vector.broadcast %85 : vector<1x8x1xf32> to vector<1x8x8xf32>
    %87 = arith.subf %83, %86 : vector<1x8x8xf32>
    %88 = math.exp %87 : vector<1x8x8xf32>
    %cst_33 = arith.constant dense<0.000000e+00> : vector<1x8xf32>
    %89 = vector.multi_reduction <add>, %88, %cst_33 [2] : vector<1x8x8xf32> to vector<1x8xf32>
    %90 = vector.shape_cast %89 : vector<1x8xf32> to vector<1x8x1xf32>
    %cst_34 = arith.constant 1.000000e+00 : f32
    %91 = vector.broadcast %cst_34 : f32 to vector<1x8x1xf32>
    %92 = arith.divf %91, %90 : vector<1x8x1xf32>
    %93 = vector.broadcast %92 : vector<1x8x1xf32> to vector<1x8x8xf32>
    %94 = arith.mulf %88, %93 : vector<1x8x8xf32>
    %95 = arith.addf %74, %94 : vector<1x8x8xf32>
    "tpu.trace_start"() <{level = 10 : i32, message = "bqk,bke->bqe"}> : () -> ()
    %cst_35 = arith.constant dense<0.000000e+00> : vector<1x8x8xf32>
    %96 = tpu.matmul %94, %78, %cst_35 {dimension_numbers = #tpu.dot_dimension_numbers<[2], [1], [1], [2], [0, 0, 0, 1, 1, 2], [0], [0]>} : vector<1x8x8xf32>, vector<1x8x8xf32>, vector<1x8x8xf32> -> vector<1x8x8xf32>
    "tpu.trace_stop"() : () -> ()
    %cst_36 = arith.constant 2.500000e-01 : f32
    %97 = vector.broadcast %cst_36 : f32 to vector<1x8x8xf32>
    %98 = arith.mulf %95, %97 : vector<1x8x8xf32>
    %c0_37 = arith.constant 0 : index
    %c0_38 = arith.constant 0 : index
    %c0_39 = arith.constant 0 : index
    %99 = vector.load %arg10[%c0_37, %c0_38, %c0_39] : memref<1x8x8xf32, #tpu.memory_space<vmem>>, vector<1x8x8xf32>
    tpu.vector_store %arg10[%c0_37, %c0_38, %c0_39], %98 {strides = array<i32>} : memref<1x8x8xf32, #tpu.memory_space<vmem>>, vector<1x8x8xf32>,
    %100 = tpu.concatenate %33, %54, %75, %96 in 2 : vector<1x8x8xf32>, vector<1x8x8xf32>, vector<1x8x8xf32>, vector<1x8x8xf32> -> vector<1x8x32xf32>
    %101 = vector.shape_cast %100 : vector<1x8x32xf32> to vector<8x32xf32>
    %c0_40 = arith.constant 0 : index
    %c0_41 = arith.constant 0 : index
    %102 = vector.load %arg8[%c0_40, %c0_41] : memref<7x32xf32, #tpu.memory_space<vmem>>, vector<7x32xf32>
    %103 = vector.extract_strided_slice %102 {offsets = [0, 0], sizes = [1, 32], strides = [1, 1]} : vector<7x32xf32> to vector<1x32xf32>
    %104 = vector.extract_strided_slice %102 {offsets = [1, 0], sizes = [1, 32], strides = [1, 1]} : vector<7x32xf32> to vector<1x32xf32>
    %105 = vector.extract_strided_slice %102 {offsets = [2, 0], sizes = [1, 32], strides = [1, 1]} : vector<7x32xf32> to vector<1x32xf32>
    %106 = vector.extract_strided_slice %102 {offsets = [3, 0], sizes = [1, 32], strides = [1, 1]} : vector<7x32xf32> to vector<1x32xf32>
    %107 = vector.extract_strided_slice %102 {offsets = [4, 0], sizes = [1, 32], strides = [1, 1]} : vector<7x32xf32> to vector<1x32xf32>
    %108 = vector.extract_strided_slice %102 {offsets = [5, 0], sizes = [1, 32], strides = [1, 1]} : vector<7x32xf32> to vector<1x32xf32>
    %109 = vector.extract_strided_slice %102 {offsets = [6, 0], sizes = [1, 32], strides = [1, 1]} : vector<7x32xf32> to vector<1x32xf32>
    %c0_42 = arith.constant 0 : index
    %c0_43 = arith.constant 0 : index
    %110 = vector.load %arg5[%c0_42, %c0_43] : memref<32x32xf32, #tpu.memory_space<vmem>>, vector<32x32xf32>
    %cst_44 = arith.constant dense<0.000000e+00> : vector<8x32xf32>
    %111 = tpu.matmul %101, %110, %cst_44 {dimension_numbers = #tpu.dot_dimension_numbers<[1], [0], [0], [1], [0, 0, 1, 1], [], []>} : vector<8x32xf32>, vector<32x32xf32>, vector<8x32xf32> -> vector<8x32xf32>
    %112 = vector.broadcast %103 : vector<1x32xf32> to vector<8x32xf32>
    %113 = arith.addf %111, %112 : vector<8x32xf32>
    %114 = arith.addf %113, %1 : vector<8x32xf32>
    %cst_45 = arith.constant dense<0.000000e+00> : vector<8xf32>
    %115 = vector.multi_reduction <add>, %114, %cst_45 [1] : vector<8x32xf32> to vector<8xf32>
    %116 = vector.shape_cast %115 : vector<8xf32> to vector<8x1xf32>
    %cst_46 = arith.constant 3.200000e+01 : f32
    %117 = vector.broadcast %cst_46 : f32 to vector<8x1xf32>
    %118 = arith.divf %116, %117 : vector<8x1xf32>
    %119 = vector.broadcast %118 : vector<8x1xf32> to vector<8x32xf32>
    %120 = arith.subf %114, %119 : vector<8x32xf32>
    %121 = arith.mulf %120, %120 : vector<8x32xf32>
    %cst_47 = arith.constant dense<0.000000e+00> : vector<8xf32>
    %122 = vector.multi_reduction <add>, %121, %cst_47 [1] : vector<8x32xf32> to vector<8xf32>
    %123 = vector.shape_cast %122 : vector<8xf32> to vector<8x1xf32>
    %cst_48 = arith.constant 3.200000e+01 : f32
    %124 = vector.broadcast %cst_48 : f32 to vector<8x1xf32>
    %125 = arith.divf %123, %124 : vector<8x1xf32>
    %126 = vector.broadcast %118 : vector<8x1xf32> to vector<8x32xf32>
    %127 = arith.subf %114, %126 : vector<8x32xf32>
    %cst_49 = arith.constant 9.99999974E-6 : f32
    %128 = vector.broadcast %cst_49 : f32 to vector<8x1xf32>
    %129 = arith.addf %125, %128 : vector<8x1xf32>
    %130 = math.rsqrt %129 : vector<8x1xf32>
    %131 = vector.broadcast %130 : vector<8x1xf32> to vector<8x32xf32>
    %132 = arith.mulf %127, %131 : vector<8x32xf32>
    %133 = vector.broadcast %106 : vector<1x32xf32> to vector<8x32xf32>
    %134 = arith.mulf %132, %133 : vector<8x32xf32>
    %135 = vector.broadcast %107 : vector<1x32xf32> to vector<8x32xf32>
    %136 = arith.addf %134, %135 : vector<8x32xf32>
    %c0_50 = arith.constant 0 : index
    %c0_51 = arith.constant 0 : index
    %137 = vector.load %arg6[%c0_50, %c0_51] : memref<32x32xf32, #tpu.memory_space<vmem>>, vector<32x32xf32>
    %cst_52 = arith.constant dense<0.000000e+00> : vector<8x32xf32>
    %138 = tpu.matmul %136, %137, %cst_52 {dimension_numbers = #tpu.dot_dimension_numbers<[1], [0], [0], [1], [0, 0, 1, 1], [], []>} : vector<8x32xf32>, vector<32x32xf32>, vector<8x32xf32> -> vector<8x32xf32>
    %139 = vector.broadcast %104 : vector<1x32xf32> to vector<8x32xf32>
    %140 = arith.addf %138, %139 : vector<8x32xf32>
    %cst_53 = arith.constant 0.000000e+00 : f32
    %141 = vector.broadcast %cst_53 : f32 to vector<8x32xf32>
    %142 = arith.maximumf %140, %141 : vector<8x32xf32>
    %c0_54 = arith.constant 0 : index
    %c0_55 = arith.constant 0 : index
    %143 = vector.load %arg7[%c0_54, %c0_55] : memref<32x32xf32, #tpu.memory_space<vmem>>, vector<32x32xf32>
    %cst_56 = arith.constant dense<0.000000e+00> : vector<8x32xf32>
    %144 = tpu.matmul %142, %143, %cst_56 {dimension_numbers = #tpu.dot_dimension_numbers<[1], [0], [0], [1], [0, 0, 1, 1], [], []>} : vector<8x32xf32>, vector<32x32xf32>, vector<8x32xf32> -> vector<8x32xf32>
    %145 = vector.broadcast %105 : vector<1x32xf32> to vector<8x32xf32>
    %146 = arith.addf %144, %145 : vector<8x32xf32>
    %147 = arith.addf %146, %136 : vector<8x32xf32>
    %cst_57 = arith.constant dense<0.000000e+00> : vector<8xf32>
    %148 = vector.multi_reduction <add>, %147, %cst_57 [1] : vector<8x32xf32> to vector<8xf32>
    %149 = vector.shape_cast %148 : vector<8xf32> to vector<8x1xf32>
    %cst_58 = arith.constant 3.200000e+01 : f32
    %150 = vector.broadcast %cst_58 : f32 to vector<8x1xf32>
    %151 = arith.divf %149, %150 : vector<8x1xf32>
    %152 = vector.broadcast %151 : vector<8x1xf32> to vector<8x32xf32>
    %153 = arith.subf %147, %152 : vector<8x32xf32>
    %154 = arith.mulf %153, %153 : vector<8x32xf32>
    %cst_59 = arith.constant dense<0.000000e+00> : vector<8xf32>
    %155 = vector.multi_reduction <add>, %154, %cst_59 [1] : vector<8x32xf32> to vector<8xf32>
    %156 = vector.shape_cast %155 : vector<8xf32> to vector<8x1xf32>
    %cst_60 = arith.constant 3.200000e+01 : f32
    %157 = vector.broadcast %cst_60 : f32 to vector<8x1xf32>
    %158 = arith.divf %156, %157 : vector<8x1xf32>
    %159 = vector.broadcast %151 : vector<8x1xf32> to vector<8x32xf32>
    %160 = arith.subf %147, %159 : vector<8x32xf32>
    %cst_61 = arith.constant 9.99999974E-6 : f32
    %161 = vector.broadcast %cst_61 : f32 to vector<8x1xf32>
    %162 = arith.addf %158, %161 : vector<8x1xf32>
    %163 = math.rsqrt %162 : vector<8x1xf32>
    %164 = vector.broadcast %163 : vector<8x1xf32> to vector<8x32xf32>
    %165 = arith.mulf %160, %164 : vector<8x32xf32>
    %166 = vector.broadcast %108 : vector<1x32xf32> to vector<8x32xf32>
    %167 = arith.mulf %165, %166 : vector<8x32xf32>
    %168 = vector.broadcast %109 : vector<1x32xf32> to vector<8x32xf32>
    %169 = arith.addf %167, %168 : vector<8x32xf32>
    %170 = vector.shape_cast %169 : vector<8x32xf32> to vector<1x8x32xf32>
    %c0_62 = arith.constant 0 : index
    %c0_63 = arith.constant 0 : index
    %c0_64 = arith.constant 0 : index
    %171 = vector.load %arg9[%c0_62, %c0_63, %c0_64] : memref<1x8x32xf32, #tpu.memory_space<vmem>>, vector<1x8x32xf32>
    tpu.vector_store %arg9[%c0_62, %c0_63, %c0_64], %170 {strides = array<i32>} : memref<1x8x32xf32, #tpu.memory_space<vmem>>, vector<1x8x32xf32>,
    return
  }
  func.func @transform_0(%arg0: i32) -> (i32, i32, i32) {
    %c0_i32 = arith.constant 0 : i32
    %c0_i32_0 = arith.constant 0 : i32
    %c0_i32_1 = arith.constant 0 : i32
    return %arg0, %c0_i32, %c0_i32_0 : i32, i32, i32
  }
  func.func @transform_1(%arg0: i32) -> (i32, i32, i32) {
    %c0_i32 = arith.constant 0 : i32
    %c0_i32_0 = arith.constant 0 : i32
    %c0_i32_1 = arith.constant 0 : i32
    return %arg0, %c0_i32, %c0_i32_0 : i32, i32, i32
  }
  func.func @transform_2(%arg0: i32) -> (i32, i32) {
    %c0_i32 = arith.constant 0 : i32
    %c0_i32_0 = arith.constant 0 : i32
    %c0_i32_1 = arith.constant 0 : i32
    return %c0_i32, %c0_i32_0 : i32, i32
  }
  func.func @transform_3(%arg0: i32) -> (i32, i32) {
    %c0_i32 = arith.constant 0 : i32
    %c0_i32_0 = arith.constant 0 : i32
    %c0_i32_1 = arith.constant 0 : i32
    return %c0_i32, %c0_i32_0 : i32, i32
  }
  func.func @transform_4(%arg0: i32) -> (i32, i32) {
    %c0_i32 = arith.constant 0 : i32
    %c0_i32_0 = arith.constant 0 : i32
    %c0_i32_1 = arith.constant 0 : i32
    return %c0_i32, %c0_i32_0 : i32, i32
  }
  func.func @transform_5(%arg0: i32) -> (i32, i32) {
    %c0_i32 = arith.constant 0 : i32
    %c0_i32_0 = arith.constant 0 : i32
    %c0_i32_1 = arith.constant 0 : i32
    return %c0_i32, %c0_i32_0 : i32, i32
  }
  func.func @transform_6(%arg0: i32) -> (i32, i32) {
    %c0_i32 = arith.constant 0 : i32
    %c0_i32_0 = arith.constant 0 : i32
    %c0_i32_1 = arith.constant 0 : i32
    return %c0_i32, %c0_i32_0 : i32, i32
  }
  func.func @transform_7(%arg0: i32) -> (i32, i32) {
    %c0_i32 = arith.constant 0 : i32
    %c0_i32_0 = arith.constant 0 : i32
    %c0_i32_1 = arith.constant 0 : i32
    return %c0_i32, %c0_i32_0 : i32, i32
  }
  func.func @transform_8(%arg0: i32) -> (i32, i32, i32) {
    %c0_i32 = arith.constant 0 : i32
    %c0_i32_0 = arith.constant 0 : i32
    %c0_i32_1 = arith.constant 0 : i32
    return %arg0, %c0_i32, %c0_i32_0 : i32, i32, i32
  }
  func.func @transform_9(%arg0: i32) -> (i32, i32, i32) {
    %c0_i32 = arith.constant 0 : i32
    %c0_i32_0 = arith.constant 0 : i32
    %c0_i32_1 = arith.constant 0 : i32
    return %arg0, %c0_i32, %c0_i32_0 : i32, i32, i32
  }
}

</mosaic_0001>

<bundles_post_ra>
// kernel: tpu_custom_call.1
= control target key start
LH: loop header
LB: loop body
LE: loop exit
PB: predicated region body
PF: predicated region fallthrough
CT: control target
= control target key end

     0   :  { %s2798_s0 = inlined_call_operand.hbm [shape: f32[2,8,32], index: 0, kind: input, shape index: {}]   ;;  %s2799_s1 = inlined_call_operand.hbm [shape: f32[2,1,8], index: 1, kind: input, shape index: {}]   ;;  %s2800_s2 = inlined_call_operand.hbm [shape: f32[32,96], index: 2, kind: input, shape index: {}]   ;;  %s2801_s3 = inlined_call_operand.vmem [shape: f32[1,96], index: 3, kind: input, shape index: {}]   ;;  %s2802_s4 = inlined_call_operand.hbm [shape: f32[32,32], index: 4, kind: input, shape index: {}]   ;;  %s2803_s5 = inlined_call_operand.hbm [shape: f32[32,32], index: 5, kind: input, shape index: {}]   ;;  %s2804_s6 = inlined_call_operand.hbm [shape: f32[32,32], index: 6, kind: input, shape index: {}]   ;;  %s2805_s7 = inlined_call_operand.vmem [shape: f32[7,32], index: 7, kind: input, shape index: {}]   ;;  %s2806_s8 = inlined_call_operand.hbm [shape: f32[2,8,32], index: 8, kind: output, shape index: {0}]   ;;  %s2807_s9 = inlined_call_operand.hbm [shape: f32[2,8,8], index: 9, kind: output, shape index: {1}]  }
   0x1   :  { %2812 = sst [smem:[#allocation24_spill]] %s2798_s0 }
   0x2   :  { %2813 = sst [smem:[#allocation25_spill]] %s2800_s2 }
   0x3   :  { %2814 = sst [smem:[#allocation26_spill]] %s2802_s4 }
   0x4   :  { %2815 = sst [smem:[#allocation27_spill]] %s2803_s5 }
   0x5   :  { %2816 = sst [smem:[#allocation28_spill]] %s2804_s6 }
   0x6   :  { %15 = vsyncpa [#allocation3], 0 }
   0x7   :  { %17 = vsyncpa [#allocation3 + $0x1], 0 }
   0x8   :  { %18 = vsyncpa [#allocation6], 0 }
   0x9   :  { %20 = vsyncpa [#allocation6 + $0x1], 0 }
   0xa   :  { %21 = vsyncpa [#allocation9], 0 }
   0xb   :  { %22 = vsyncpa [#allocation12], 0 }
   0xc   :  { %23 = vsyncpa [#allocation4], 0 }
   0xd   :  { %25 = vsyncpa [#allocation4 + $0x1], 0 }
   0xe   :  { %26 = vsyncpa [#allocation15], 0 }
   0xf   :  { %28 = vsyncpa [#allocation15 + $0x1], 0  ;;  %s2371_s30 = smov 0   ;;  %s2373_s10 = smov 0  }
  0x10   :  { %s2375_s11 = smov 0   ;;  %s2377_s12 = smov 0  }
  0x11 LB: > { %s2295_s13 = smov [#allocation7]   ;;  %s2392_s15 = sadd.s32 4294967295, %s2293_s12   ;;  %s2293_s12 = sphi %s2377_s12, %s2846_s12   ;;  %s2289_s11 = sphi %s2375_s11, %s2845_s11   ;;  %s2285_s10 = sphi %s2373_s10, %s2844_s10   ;;  %s2281_s30 = sphi %s2371_s30, %s2843_s30  }
  0x12   : > { %s281_s14 = sshll.u32 %s2295_s13, 4  ;;  %p1728_p0 = scmp.ge.s32.totalorder %s2293_s12, 1  ;;  %s282_s14 = int_to_ptr.vmem [resolvable:$true] %s281_s14 }
  0x13   : > { %p2808_p1 = scmp.eq.s32.totalorder %s2392_s15, 0  ;;  %p269_p2 = scmp.lt.s32.totalorder %s2293_s12, 3 }
  0x14   : > { %s2296_s17 = smov [#allocation8]   ;;  %s2297_s20 = smov [#allocation10]  }
  0x15   : > { %p2397_p3 = pnand %p1728_p0, %p269_p2  ;;  %s297_s18 = sshll.u32 %s2296_s17, 4  ;;  %s2410_s18 = int_to_ptr.vmem [resolvable:$true] %s297_s18 }
  0x16   : > { %s310_s21 = sshll.u32 %s2297_s20, 4  ;;  %s2034_s22 = scalar_lea.vmem %s282_s14, 512  ;;  %s2412_s21 = int_to_ptr.vmem [resolvable:$true] %s310_s21 }
  0x17   : > { %s2817_s16 = scalar_select %p2397_p3, 1, 0 }
  0x18   : > { %p1912_p5 = pneg %p2397_p3  ;;  %p2035_p8 = scmp.ne.s32.totalorder %s282_s14, %s2034_s22 }
  0x19   : > { %p2042_p11 = scmp.lt.s32.totalorder %s282_s14, %s282_s14  ;;  %p2043_p12 = scmp.lt.s32.totalorder %s2034_s22, %s2034_s22 }
  0x1a   : > { %p2406_p6 = pnand %p1912_p5, %p2808_p1 }
  0x1b   : > { %p2044_p13 = por %p2043_p12, %p2042_p11 }
  0x1c   : > { %p2025_p7 = pneg %p2406_p6 }
  0x1e   : > { %p2037_p9 = pnand %p2035_p8, %p2025_p7 }
  0x20   : > { %p2038_p10 = pneg %p2037_p9 }
  0x22   : > { %p2045_p0 = pnand %p2044_p13, %p2038_p10 }
  0x24   : > { %2048 = shalt.err (!%p2045_p0)
}
  0x25   : > { %s2298_s23 = smov 128   ;;  %s2299_s24 = smov 8  }
  0x26   : > { %s2819_s2 = sld [smem:[#allocation25_spill]]  ;;  %s2060_s27 = scalar_lea.vmem %s2410_s18, 512 }
  0x27   : > { %p2061_p2 = scmp.ne.s32.totalorder %s2410_s18, %s2060_s27  ;;  %p2068_p9 = scmp.lt.s32.totalorder %s2410_s18, %s2410_s18 }
  0x28   : > { %p2069_p10 = scmp.lt.s32.totalorder %s2060_s27, %s2060_s27 }
  0x29   : > { %p2063_p5 = pnand %p2061_p2, %p2025_p7 }
  0x2a   : > { %p2070_p11 = por %p2069_p10, %p2068_p9 }
  0x2b   : > { %p2064_p8 = pneg %p2063_p5 }
  0x2c   : > { %1915 = dma.hbm_to_vmem [thread:$0]  (!%p2406_p6), %s2819_s2, 512, %s282_s14, [#allocation6], %s2298_s23, %s2298_s23, %s2299_s24  }
  0x2d   : > { %p2071_p12 = pnand %p2070_p11, %p2064_p8 }
  0x2f   : > { %2074 = shalt.err (!%p2071_p12)
}
  0x30   : > { %s2820_s4 = sld [smem:[#allocation26_spill]]  ;;  %s2086_s13 = scalar_lea.vmem %s2412_s21, 512 }
  0x31   : > { %p2087_p13 = scmp.ne.s32.totalorder %s2412_s21, %s2086_s13  ;;  %p2094_p5 = scmp.lt.s32.totalorder %s2412_s21, %s2412_s21 }
  0x32   : > { %p2095_p8 = scmp.lt.s32.totalorder %s2086_s13, %s2086_s13 }
  0x33   : > { %p2089_p0 = pnand %p2087_p13, %p2025_p7 }
  0x34   : > { %p2096_p9 = por %p2095_p8, %p2094_p5 }
  0x35   : > { %p2090_p2 = pneg %p2089_p0 }
  0x36   : > { %1918 = dma.hbm_to_vmem [thread:$0]  (!%p2406_p6), %s2820_s4, 512, %s2410_s18, [#allocation9], %s2298_s23, %s2298_s23, %s2299_s24  }
  0x37   : > { %p2097_p10 = pnand %p2096_p9, %p2090_p2 }
  0x39   : > { %2100 = shalt.err (!%p2097_p10)
}
  0x3a   : > { %s2821_s5 = sld [smem:[#allocation27_spill]]  ;;  %s2300_s18 = smov [#allocation11]  }
  0x3b   : > { %s323_s20 = sshll.u32 %s2300_s18, 4  ;;  %s324_s20 = int_to_ptr.vmem [resolvable:$true] %s323_s20 }
  0x3c   : > { %s2112_s22 = scalar_lea.vmem %s324_s20, 512  ;;  %p2120_p0 = scmp.lt.s32.totalorder %s324_s20, %s324_s20 }
  0x3d   : > { %p2113_p11 = scmp.ne.s32.totalorder %s324_s20, %s2112_s22  ;;  %p2121_p2 = scmp.lt.s32.totalorder %s2112_s22, %s2112_s22 }
  0x3f   : > { %p2115_p12 = pnand %p2113_p11, %p2025_p7  ;;  %p2122_p5 = por %p2121_p2, %p2120_p0 }
  0x40   : > { %1921 = dma.hbm_to_vmem [thread:$0]  (!%p2406_p6), %s2821_s5, 512, %s2412_s21, [#allocation9], %s2298_s23, %s2298_s23, %s2299_s24  }
  0x41   : > { %p2116_p13 = pneg %p2115_p12 }
  0x43   : > { %p2123_p8 = pnand %p2122_p5, %p2116_p13 }
  0x45   : > { %2126 = shalt.err (!%p2123_p8)
}
  0x46   : > { %s2822_s6 = sld [smem:[#allocation28_spill]]  ;;  %s1727_s19 = sadd.s32 4294967294, %s2293_s12  }
  0x47   : > { %s2472_s26 = sadd.s32 1, %s2293_s12   ;;  %s41_s28 = sadd.s32 1, %s2289_s11 }
  0x48   : > { %s38_s27 = ssub.s32 %s2293_s12, %s2472_s26  ;;  %p48_p9 = scmp.ne.s32.totalorder %s2289_s11, %s2285_s10 }
  0x49   : > { %p39_p7 = scmp.eq.s32.totalorder %s38_s27, 0  ;;  %p49_p10 = scmp.eq.s32.totalorder %s2293_s12, 0 }
  0x4a   : > { %p54_p11 = scmp.ne.s32.totalorder %s2285_s10, %s2281_s30  ;;  %p230_p13 = scmp.eq.s32.totalorder %s2392_s15, 1 }
  0x4b   : > { %s2483_s29 = scalar_select %p39_p7, %s2289_s11, %s41_s28  }
  0x4c   : > { %1924 = dma.hbm_to_vmem [thread:$0]  (!%p2406_p6), %s2822_s6, 512, %s324_s20, [#allocation12], %s2298_s23, %s2298_s23, %s2299_s24  }
  0x4d   : > { %2823 = sst [smem:[#allocation23_spill]] %s2483_s29  ;;  %p2485_p12 = por %p49_p10, %p48_p9 }
  0x4e   : > { %p2491_p6 = por %p2808_p1, %p54_p11  ;;  %p236_p0 = scmp.eq.s32.totalorder %s1727_s19, 1 }
  0x4f   : > { %p1943_p2 = scmp.lt.s32.totalorder %s2293_s12, 2  ;;  %s2498_s24 = sand.u32 1, %s2289_s11  }
  0x50   : > { %s2825_s23 = scalar_select %p2491_p6, 1, 0 }
  0x51   : > { %p2500_p5 = por %p230_p13, %p48_p9  ;;  %p2504_p8 = por %p236_p0, %p54_p11 }
  0x52   : > { %s1734_s18 = sshll.u32 %s2498_s24, 3  ;;  %s1735_s20 = sshll.u32 %s2293_s12, 7 }
  0x53   : > { %s2826_s14 = scalar_select %p2500_p5, 1, 0 }
  0x54   : > { %s2827_s17 = scalar_select %p2504_p8, 1, 0 }
  0x55   : > { %s2828_s0 = sld [smem:[#allocation24_spill]]  ;;  %s344_s19 = scalar_lea.vmem [#allocation2], %s1734_s18 }
  0x56   : > { %s351_s27 = sshll.u32 %s344_s19, 4  ;;  %p2519_p7 = pnand %p1943_p2, %p2485_p12  ;;  %s2515_s27 = int_to_ptr.vmem [resolvable:$true] %s351_s27 }
  0x57   : > { %s341_s4 = scalar_lea.sflag [#allocation3], %s2498_s24 }
  0x58   : > { %p2129_p10 = pneg %p2519_p7 }
  0x5b   : > { %s2513_s25 = scalar_lea.hbm %s2828_s0, %s1735_s20  ;;  %s2132_s13 = scalar_lea.hbm %s2828_s0, 256 }
  0x5c   : > { %s2127_s5 = scalar_lea.hbm %s2513_s25, 128  ;;  %p2133_p12 = scmp.lt.s32.totalorder %s2513_s25, %s2828_s0 }
  0x5d   : > { %p2128_p9 = scmp.ne.s32.totalorder %s2513_s25, %s2127_s5  ;;  %p2134_p0 = scmp.lt.s32.totalorder %s2132_s13, %s2127_s5 }
  0x5f   : > { %p2130_p11 = pnand %p2129_p10, %p2128_p9  ;;  %p2135_p2 = por %p2134_p0, %p2133_p12 }
  0x61   : > { %p2131_p13 = pneg %p2130_p11 }
  0x63   : > { %p2136_p4 = pnand %p2135_p2, %p2131_p13 }
  0x65   : > { %2139 = shalt.err (!%p2136_p4)
}
  0x66   : > { %s2140_s19 = scalar_lea.vmem %s2515_s27, 128  ;;  %s2301_s18 = smov [#allocation2]  }
  0x67   : > { %p2141_p1 = scmp.ne.s32.totalorder %s2515_s27, %s2140_s19  ;;  %s2145_s20 = sshll.u32 %s2301_s18, 4  ;;  %s2146_s20 = int_to_ptr.vmem [resolvable:$false] %s2145_s20 }
  0x68   : > { %s2147_s2 = scalar_lea.vmem %s2146_s20, 256  ;;  %p2148_p8 = scmp.lt.s32.totalorder %s2515_s27, %s2146_s20 }
  0x69   : > { %p2143_p9 = pnand %p2141_p1, %p2129_p10  ;;  %p2149_p5 = scmp.lt.s32.totalorder %s2147_s2, %s2140_s19 }
  0x6b   : > { %p2144_p11 = pneg %p2143_p9  ;;  %p2150_p6 = por %p2149_p5, %p2148_p8 }
  0x6d   : > { %p2151_p12 = pnand %p2150_p6, %p2144_p11 }
  0x6f   : > { %2154 = shalt.err (!%p2151_p12)
}
  0x70   : > { %1928 = dma.hbm_to_vmem [thread:$0]  (!%p2519_p7), %s2513_s25, 128, %s2515_s27, %s341_s4  }
  0x71   : > { %s1736_s5 = sshll.u32 %s2293_s12, 4  ;;  %s361_s13 = scalar_lea.vmem [#allocation5], %s2498_s24 }
  0x72   : > { %s368_s22 = sshll.u32 %s361_s13, 4  ;;  %s366_s20 = scalar_lea.hbm %s2799_s1, %s1736_s5  ;;  %s369_s22 = int_to_ptr.vmem [resolvable:$true] %s368_s22 }
  0x73   : > { %s2830_s2 = sand.u32 1, %s2293_s12   ;;  %s2155_s0 = scalar_lea.hbm %s366_s20, 16 }
  0x74   : > { %s359_s19 = scalar_lea.sflag [#allocation6], %s2830_s2  ;;  %p2156_p1 = scmp.ne.s32.totalorder %s366_s20, %s2155_s0 }
  0x75   : > { %s2160_s4 = scalar_lea.hbm %s2799_s1, 32  ;;  %p2161_p5 = scmp.lt.s32.totalorder %s366_s20, %s2799_s1 }
  0x76   : > { %p2158_p4 = pnand %p2156_p1, %p2129_p10  ;;  %p2162_p8 = scmp.lt.s32.totalorder %s2160_s4, %s2155_s0 }
  0x78   : > { %p2159_p6 = pneg %p2158_p4  ;;  %p2163_p13 = por %p2162_p8, %p2161_p5 }
  0x7a   : > { %p2164_p0 = pnand %p2163_p13, %p2159_p6 }
  0x7c   : > { %2167 = shalt.err (!%p2164_p0)
}
  0x7d   : > { %s2168_s27 = scalar_lea.vmem %s369_s22, 16  ;;  %s2302_s5 = smov [#allocation5]  }
  0x7e   : > { %p2169_p2 = scmp.ne.s32.totalorder %s369_s22, %s2168_s27  ;;  %s2173_s13 = sshll.u32 %s2302_s5, 4  ;;  %s2174_s13 = int_to_ptr.vmem [resolvable:$false] %s2173_s13 }
  0x7f   : > { %s2175_s6 = scalar_lea.vmem %s2174_s13, 32  ;;  %p2176_p12 = scmp.lt.s32.totalorder %s369_s22, %s2174_s13 }
  0x80   : > { %p2171_p9 = pnand %p2169_p2, %p2129_p10  ;;  %p2177_p1 = scmp.lt.s32.totalorder %s2175_s6, %s2168_s27 }
  0x82   : > { %p2172_p11 = pneg %p2171_p9  ;;  %p2178_p4 = por %p2177_p1, %p2176_p12 }
  0x84   : > { %p2179_p3 = pnand %p2178_p4, %p2172_p11 }
  0x86   : > { %2182 = shalt.err (!%p2179_p3)
}
  0x87   : > { %1931 = dma.hbm_to_vmem [thread:$0]  (!%p2519_p7), %s366_s20, 16, %s369_s22, %s359_s19  }
  0x88   : > { %p2831_p6 = scmp.ne.s32.totalorder %s2817_s16, 0 }
  0x89   : > { %s2573_s0 = sand.u32 (!%p2831_p6), 1, %s2285_s10   ;;  %p2832_p10 = scmp.ne.s32.totalorder (!%p2831_p6), %s2825_s23, 0 }
  0x8a   : > { %377 = sbr.rel (%p2831_p6) target bundleno = 3075 (0xc03), region = 52  ;;  %s2576_s29 = sshll.u32 (!%p2831_p6), %s2573_s0, 3 }
  0x8b   : > { %s380_s21 = scalar_lea.sflag (!%p2831_p6), [#allocation3], %s2573_s0  ;;  %s383_s18 = scalar_lea.vmem (!%p2831_p6), [#allocation2], %s2576_s29 }
  0x8f   : > { %2252 = dma.done.wait (%p2832_p10), %s380_s21, 128  }
  0x90   : > { %2254 = vsyncadd (%p2832_p10), %s380_s21, 4294967168  ;;  %s388_s16 = sand.u32 1, %s2392_s15   ;;  %s391_s22 = scalar_lea.vmem [#allocation5], %s2573_s0 }
  0x91   : > { %s389_s28 = scalar_lea.sflag [#allocation6], %s388_s16 }
  0x92   : > { %2256 = dma.done.wait (%p2832_p10), %s389_s28, 16  }
  0x93   : > { %2258 = vsyncadd (%p2832_p10), %s389_s28, 4294967280  ;;  %p2833_p3 = scmp.eq.s32.totalorder %s2392_s15, 0 }
  0x95   : > { %2260 = dma.done.wait (%p2833_p3), [#allocation6], 512   ;;  %p2834_p7 = pmov %p2833_p3 }
  0x96   : > { %p2835_p5 = pmov %p2833_p3 }
  0x97   : > { %2262 = vsyncadd (%p2834_p7), [#allocation6], 4294966784 }
  0x98   : > { %2264 = dma.done.wait (%p2835_p5), [#allocation9], 1024   ;;  %p2836_p8 = pmov %p2833_p3 }
  0x99   : > { %p2837_p13 = pmov %p2833_p3 }
  0x9a   : > { %2266 = vsyncadd (%p2836_p8), [#allocation9], 4294966272 }
  0x9b   : > { %2268 = dma.done.wait (%p2837_p13), [#allocation12], 512   ;;  %p2838_p0 = pmov %p2833_p3 }
  0x9c   : > { %v2303_v0 = vmov 0.0   ;;  %vm2304_vm0 = vmmov 0   ;;  %v455_v1 = vld [vmem:[#allocation7 + $0x18] sm:$0xff]  ;;  %v454_v2 = vld [vmem:[#allocation7 + $0x10] sm:$0xff]  ;;  %v453_v3 = vld [vmem:[#allocation7 + $0x8] sm:$0xff]  ;;  %vm463_vm1 = vcmask 261120   ;;  %v620_v15 = vlaneseq }
  0x9d   : > { %2270 = vsyncadd (%p2838_p0), [#allocation12], 4294966784  ;;  %1804 = vmatprep.subr.mxu0 %v2303_v0  ;;  %1812 = vmatprep.mubr.msk.f32.mxu0 %vm2304_vm0, %v2303_v0  ;;  %v452_v4 = vld [vmem:[#allocation7] sm:$0xff]  ;;  %v2610_v5 = vld [vmem:[%s383_s18] sm:$0xff]  ;;  %s2305_s2 = smov 64   ;;  %s2306_s19 = smov 96  }
  0x9e   : > { %1815 = vmatprep.subr.mxu1 %v2303_v0  ;;  %1817 = vmatprep.mubr.msk.f32.mxu1 %vm2304_vm0, %v2303_v0  ;;  %v1745_v6 = vld [vmem:[%s2801_s3] ss:$0 sm:$0xff]  ;;  %s2307_s4 = smov 88   ;;  %s2308_s25 = smov 120   ;;  %vm543_vm2 = vcmask 64512   ;;  %v2639_v17 = vshrl.u32 %v620_v15, 7 }
  0x9f   : > { %1805 = vmatpush3.msra.mxu0 %v455_v1  ;;  %s2309_s24 = smov 80   ;;  %v537_v16 = vld [vmem:[%s391_s22] sm:$0x1]  ;;  %s2310_s27 = smov 72   ;;  %vm1236_vm4 = vcmask 130048   ;;  %vm1238_vm5 = vcmask 195584  }
  0xa0   : > { %1806 = vmatprep.subr.mxu0 %v2303_v0  ;;  %vm538_vm3 = vcmp.eq.f32.partialorder %v537_v16, 0.0  ;;  %v622_v18 = vsub.s32 0, %v2639_v17  ;;  %s2311_s5 = smov 112   ;;  %s2312_s13 = smov 104  }
  0xa1   : > { %1807 = vmatpush3.msra.mxu0 %v454_v2  ;;  %v539_v19 = vsel %vm538_vm3, -1e+30, %v2303_v0  ;;  %s2313_s6 = smov 56   ;;  %s2314_s21 = smov 48  }
  0xa2   : > { %1808 = vmatprep.subr.mxu0 %v2303_v0  ;;  %v623_v20 = vrot.slane %v539_v19, %v622_v18  ;;  %s2315_s18 = smov 40   ;;  %s450_s16 = scalar_lea.vmem [#allocation14], %s2576_s29 }
  0xa3   : > { %1809 = vmatpush3.msra.mxu0 %v453_v3  ;;  %s2316_s28 = smov 8   ;;  %s2317_s22 = smov 16  }
  0xa4   : > { %1810 = vmatprep.subr.mxu0 %v2303_v0  ;;  %s2318_s23 = smov 24   ;;  %p2839_p9 = scmp.ne.s32.totalorder %s2826_s14, 0 }
  0xa5   : > { %1811 = vmatpush3.msra.mxu0 %v452_v4 }
  0xa6   : > { %1813 = vmatmul.mubr.msk.f32.vlgmr.msra.gmra.mxu0 %vm463_vm1, %v2610_v5  ;;  %1835 = vmatprep.subr.mxu0 %v2303_v0 }
  0xa7   : > { %1837 = vmatprep.mubr.msk.f32.mxu0 %vm2304_vm0, %v2303_v0 }
 0x166   : > { %v533_v7 = vpop.f32.mrf.mxu0 }
 0x167   : > { %v2621_v8 = vadd.f32 %v1745_v6, %v533_v7 }
 0x168   : > { %v1814_v9 = vpop.f32.mrf.mxu0 }
 0x169   : > { %638 = vrot.lane.b32.xlu1 %v2621_v8, %s2305_s2  ;;  %541 = vrot.lane.b32.xlu0 %v2621_v8, %s2306_s19  ;;  %s1764_s19 = sshll.u32 %s2392_s15, 7 }
 0x16d   : > { %716 = vrot.lane.b32.xlu1 %v2621_v8, %s2307_s4 }
 0x171   : > { %714 = vrot.lane.b32.xlu1 %v2621_v8, %s2308_s25 }
 0x175   : > { %885 = vrot.lane.b32.xlu1 %v2621_v8, %s2309_s24  ;;  %s1565_s24 = scalar_lea.hbm %s2807_s9, %s1764_s19 }
 0x1db   : > { %v639_v10 = vpop.permute.xlu1 %638  ;;  %v542_v11 = vpop.permute.xlu0 %541 }
 0x1dc   : > { %1816 = vmatpush3.xpose.msk.msra.mxu1 %vm543_vm2, %v542_v11 }
 0x1dd   : > { %1820 = vmatprep.subr.mxu1 %v2303_v0 }
 0x1df   : > { %v717_v12 = vpop.permute.xlu1 %716  ;;  %1818 = vmatmul.mubr.msk.f32.vlgmr.msra.gmra.mxu1 %vm543_vm2, %v2621_v8 }
 0x1e0   : > { %1821 = vmatpush3.msra.mxu1 %v639_v10  ;;  %1822 = vmatprep.mubr.msk.f32.mxu1 %vm2304_vm0, %v2303_v0 }
 0x1e1   : > { %1825 = vmatprep.subr.mxu1 %v2303_v0 }
 0x1e3   : > { %v715_v13 = vpop.permute.xlu1 %714 }
 0x1e7   : > { %v886_v14 = vpop.permute.xlu1 %885 }
 0x1e8   : > { %1836 = vmatpush3.xpose.msk.msra.mxu0 %vm543_vm2, %v886_v14 }
 0x1e9   : > { %1845 = vmatprep.subr.mxu0 %v2303_v0 }
 0x29f   : > { %v614_v21 = vpop.f32.mrf.mxu1 }
 0x2a0   : > { %v618_v22 = vmul.f32 0.35355338, %v614_v21 }
 0x2a1   : > { %v1819_v23 = vpop.f32.mrf.mxu1 }
 0x2a2   : > { %v625_v24 = vadd.f32 %v623_v20, %v618_v22 }
 0x2a4   : > { %v626_v25 = vsel %vm543_vm2, %v625_v24, -inf }
 0x2a5   : > { %627 = vmax.xlane.f32.xlu0 %v626_v25  ;;  %v1244_v25 = vld [vmem:[#allocation8 + $0x18] sm:$0xff] }
 0x2bb   : > { %1054 = vrot.lane.b32.xlu0 %v2621_v8, %s2310_s27  ;;  %s1567_s27 = sshll.u32 %s450_s16, 4  ;;  %s1568_s27 = int_to_ptr.vmem [resolvable:$true] %s1567_s27 }
 0x32e   : > { %v628_v26 = vpop.xlane.xlu0 %627 }
 0x32f   : > { %v629_v27 = vsub.f32 %v625_v24, %v628_v26  ;;  %v1243_v26 = vld [vmem:[#allocation8 + $0x10] sm:$0xff] }
 0x331   : > { %v630_v28 = vmul.f32 1.442695, %v629_v27  ;;  %v1242_v27 = vld [vmem:[#allocation8 + $0x8] sm:$0xff] }
 0x332   : > { %v1055_v33 = vpop.permute.xlu0 %1054 }
 0x333   : > { %2003 = vpow2.f32 %v630_v28  ;;  %v1241_v28 = vld [vmem:[#allocation8] sm:$0xff] }
 0x340   : > { %v2004_v29 = vpop.eup %2003 }
 0x341   : > { %v632_v30 = vsel %vm543_vm2, %v2004_v29, 0.0 }
 0x342   : > { %633 = vadd.xlane.f32.xlu1 %v632_v30 }
 0x353   : > { %883 = vrot.lane.b32.xlu1 %v2621_v8, %s2311_s5  ;;  %s1541_s5 = scalar_lea.sflag [#allocation15], %s2573_s0 }
 0x357   : > { %1052 = vrot.lane.b32.xlu1 %v2621_v8, %s2312_s13  ;;  %s2183_s13 = scalar_lea.vmem %s1568_s27, 128 }
 0x358   : > { %p2184_p2 = scmp.ne.s32.totalorder %s1568_s27, %s2183_s13 }
 0x35a   : > { %p2185_p11 = pnand %p2184_p2, %p2839_p9 }
 0x35c   : > { %p2186_p12 = pneg %p2185_p11 }
 0x3cb   : > { %v634_v31 = vpop.xlane.xlu1 %633 }
 0x3cc   : > { %2005 = vrcp.f32 %v634_v31 }
 0x3cf   : > { %v884_v32 = vpop.permute.xlu1 %883 }
 0x3d0   : > { %1838 = vmatmul.mubr.msk.f32.vlgmr.msra.gmra.mxu0 %vm543_vm2, %v884_v32 }
 0x3d1   : > { %1846 = vmatpush3.xpose.msk.msra.mxu0 %vm543_vm2, %v1055_v33  ;;  %1847 = vmatprep.mubr.msk.f32.mxu0 %vm2304_vm0, %v2303_v0 }
 0x3d2   : > { %1855 = vmatprep.subr.mxu0 %v2303_v0 }
 0x3d3   : > { %v1053_v34 = vpop.permute.xlu1 %1052 }
 0x3d4   : > { %1848 = vmatmul.mubr.msk.f32.vlgmr.msra.gmra.mxu0 %vm543_vm2, %v1053_v34 }
 0x3d5   : > { %1863 = vmatprep.mubr.msk.f32.mxu0 %vm2304_vm0, %v2303_v0  ;;  %1856 = vmatpush3.msra.mxu0 %v1244_v25 }
 0x3d6   : > { %1857 = vmatprep.subr.mxu0 %v2303_v0 }
 0x3d7   : > { %1858 = vmatpush3.msra.mxu0 %v1243_v26 }
 0x3d8   : > { %1859 = vmatprep.subr.mxu0 %v2303_v0 }
 0x3d9   : > { %v2006_v35 = vpop.eup %2005  ;;  %1860 = vmatpush3.msra.mxu0 %v1242_v27 }
 0x3da   : > { %v2658_v36 = vmul.f32 %v2006_v35, %v2004_v29  ;;  %1861 = vmatprep.subr.mxu0 %v2303_v0 }
 0x3db   : > { %1862 = vmatpush3.msra.mxu0 %v1241_v28 }
 0x3dc   : > { %1823 = vmatmul.mubr.msk.f32.vlgmr.msra.gmra.mxu1 %vm543_vm2, %v2658_v36  ;;  %1877 = vmatprep.subr.mxu0 %v2303_v0 }
 0x3dd   : > { %1826 = vmatpush3.xpose.msk.msra.mxu1 %vm543_vm2, %v717_v12  ;;  %1827 = vmatprep.mubr.msk.f32.mxu1 %vm2304_vm0, %v2303_v0 }
 0x3de   : > { %1830 = vmatprep.subr.mxu1 %v2303_v0 }
 0x3e0   : > { %1828 = vmatmul.mubr.msk.f32.vlgmr.msra.gmra.mxu1 %vm543_vm2, %v715_v13 }
 0x3e1   : > { %1832 = vmatprep.mubr.msk.f32.mxu1 %vm2304_vm0, %v2303_v0 }
 0x490   : > { %v957_v37 = vpop.f32.mrf.mxu0 }
 0x491   : > { %v961_v38 = vmul.f32 0.35355338, %v957_v37 }
 0x492   : > { %v1839_v39 = vpop.f32.mrf.mxu0 }
 0x493   : > { %v962_v40 = vadd.f32 %v961_v38, %v623_v20 }
 0x494   : > { %v1126_v41 = vpop.f32.mrf.mxu0 }
 0x495   : > { %v963_v42 = vsel %vm543_vm2, %v962_v40, -inf  ;;  %v1130_v47 = vmul.f32 0.35355338, %v1126_v41  ;;  %v2709_v41 = vld [vmem:[%s2805_s7] sm:$0x7f] }
 0x496   : > { %964 = vmax.xlane.f32.xlu0 %v963_v42  ;;  %v1849_v43 = vpop.f32.mrf.mxu0  ;;  %v1248_v42 = vrot.slane %v2709_v41, %v622_v18  ;;  %v1348_v18 = vld [vmem:[#allocation10 + $0x8] sm:$0xff] }
 0x497   : > { %v1131_v52 = vadd.f32 %v1130_v47, %v623_v20 }
 0x499   : > { %v1132_v53 = vsel %vm543_vm2, %v1131_v52, -inf }
 0x49c   : > { %v2670_v44 = vpop.f32.mrf.mxu1 }
 0x49e   : > { %v1824_v45 = vpop.f32.mrf.mxu1 }
 0x4a0   : > { %v788_v46 = vpop.f32.mrf.mxu1 }
 0x4a1   : > { %v792_v48 = vmul.f32 0.35355338, %v788_v46 }
 0x4a2   : > { %v1829_v49 = vpop.f32.mrf.mxu1 }
 0x4a3   : > { %v793_v50 = vadd.f32 %v792_v48, %v623_v20 }
 0x4a5   : > { %v794_v51 = vsel %vm543_vm2, %v793_v50, -inf }
 0x4a6   : > { %795 = vmax.xlane.f32.xlu1 %v794_v51 }
 0x4aa   : > { %1133 = vmax.xlane.f32.xlu1 %v1132_v53  ;;  %v1350_v53 = vld [vmem:[#allocation10 + $0x18] sm:$0xff] }
 0x51f   : > { %v965_v54 = vpop.xlane.xlu0 %964 }
 0x520   : > { %v966_v55 = vsub.f32 %v962_v40, %v965_v54  ;;  %v1349_v54 = vld [vmem:[#allocation10 + $0x10] sm:$0xff] }
 0x522   : > { %v967_v56 = vmul.f32 1.442695, %v966_v55  ;;  %v1432_v55 = vld [vmem:[#allocation11 + $0x18] sm:$0xff] }
 0x524   : > { %2007 = vpow2.f32 %v967_v56 }
 0x52f   : > { %v796_v57 = vpop.xlane.xlu1 %795 }
 0x530   : > { %v797_v2 = vsub.f32 %v793_v50, %v796_v57 }
 0x531   : > { %v2008_v58 = vpop.eup %2007 }
 0x532   : > { %v969_v59 = vsel %vm543_vm2, %v2008_v58, 0.0  ;;  %v798_v3 = vmul.f32 1.442695, %v797_v2 }
 0x533   : > { %970 = vadd.xlane.f32.xlu1 %v969_v59  ;;  %v1134_v60 = vpop.xlane.xlu1 %1133  ;;  %v1339_v59 = vsub.s32 3, %v2639_v17 }
 0x534   : > { %v1135_v61 = vsub.f32 %v1131_v52, %v1134_v60  ;;  %v1344_v60 = vsub.s32 4, %v2639_v17 }
 0x536   : > { %v1136_v62 = vmul.f32 1.442695, %v1135_v61  ;;  %v1340_v61 = vrot.slane %v2709_v41, %v1339_v59 }
 0x538   : > { %2009 = vpow2.f32 %v1136_v62 }
 0x539   : > { %2011 = vpow2.f32 %v798_v3 }
 0x544   : > { %807 = vrot.lane.b32.xlu1 %v2621_v8, %s2313_s6  ;;  %s2319_s6 = smov [#allocation14]  }
 0x545   : > { %v2010_v63 = vpop.eup %2009 }
 0x546   : > { %v1138_v1 = vsel %vm543_vm2, %v2010_v63, 0.0  ;;  %v2012_v4 = vpop.eup %2011 }
 0x547   : > { %1139 = vadd.xlane.f32.xlu0 %v1138_v1  ;;  %v800_v6 = vsel %vm543_vm2, %v2012_v4, 0.0  ;;  %v1345_v1 = vrot.slane %v2709_v41, %v1344_v60 }
 0x55d   : > { %976 = vrot.lane.b32.xlu0 %v2621_v8, %s2314_s21  ;;  %s2187_s21 = sshll.u32 %s2319_s6, 4  ;;  %s2188_s21 = int_to_ptr.vmem [resolvable:$false] %s2187_s21 }
 0x55e   : > { %p2190_p1 = scmp.lt.s32.totalorder %s1568_s27, %s2188_s21 }
 0x568   : > { %801 = vadd.xlane.f32.xlu1 %v800_v6  ;;  %v1430_v6 = vld [vmem:[#allocation11 + $0x8] sm:$0xff] }
 0x579   : > { %1145 = vrot.lane.b32.xlu1 %v2621_v8, %s2315_s18  ;;  %s2189_s18 = scalar_lea.vmem %s2188_s21, 256 }
 0x57a   : > { %p2191_p4 = scmp.lt.s32.totalorder %s2189_s18, %s2183_s13 }
 0x57c   : > { %p2192_p6 = por %p2191_p4, %p2190_p1 }
 0x57e   : > { %p2193_p10 = pnand %p2192_p6, %p2186_p12 }
 0x5bc   : > { %v971_v7 = vpop.xlane.xlu1 %970 }
 0x5bd   : > { %2013 = vrcp.f32 %v971_v7  ;;  %v1429_v7 = vld [vmem:[#allocation11] sm:$0xff] }
 0x5c0   : > { %v808_v9 = vpop.permute.xlu1 %807 }
 0x5c1   : > { %1831 = vmatpush3.msra.mxu1 %v808_v9  ;;  %v1353_v9 = vsub.s32 1, %v2639_v17 }
 0x5c2   : > { %1840 = vmatprep.subr.mxu1 %v2303_v0 }
 0x5ca   : > { %v2014_v12 = vpop.eup %2013 }
 0x5cb   : > { %v974_v8 = vmul.f32 %v2014_v12, %v2008_v58 }
 0x5d0   : > { %v1140_v10 = vpop.xlane.xlu0 %1139 }
 0x5d4   : > { %v977_v16 = vpop.permute.xlu0 %976 }
 0x5f1   : > { %v802_v11 = vpop.xlane.xlu1 %801 }
 0x5f2   : > { %2015 = vrcp.f32 %v802_v11 }
 0x5f3   : > { %2017 = vrcp.f32 %v1140_v10  ;;  %v1354_v10 = vrot.slane %v2709_v41, %v1353_v9 }
 0x5f5   : > { %v1146_v22 = vpop.permute.xlu1 %1145 }
 0x5ff   : > { %v2016_v13 = vpop.eup %2015 }
 0x600   : > { %v805_v14 = vmul.f32 %v2016_v13, %v2012_v4  ;;  %v2018_v15 = vpop.eup %2017  ;;  %v1431_v4 = vld [vmem:[#allocation11 + $0x10] sm:$0xff] }
 0x601   : > { %v1143_v21 = vmul.f32 %v2018_v15, %v2010_v63  ;;  %v1435_v15 = vsub.s32 2, %v2639_v17 }
 0x602   : > { %v806_v19 = vadd.f32 %v805_v14, %v2658_v36  ;;  %1833 = vmatmul.mubr.msk.f32.vlgmr.msra.gmra.mxu1 %vm543_vm2, %v805_v14 }
 0x603   : > { %1841 = vmatpush3.msra.mxu1 %v977_v16  ;;  %1842 = vmatprep.mubr.msk.f32.mxu1 %vm2304_vm0, %v2303_v0  ;;  %v1436_v16 = vrot.slane %v2709_v41, %v1435_v15 }
 0x604   : > { %1850 = vmatprep.subr.mxu1 %v2303_v0  ;;  %v975_v20 = vadd.f32 %v974_v8, %v806_v19 }
 0x606   : > { %1843 = vmatmul.mubr.msk.f32.vlgmr.msra.gmra.mxu1 %vm543_vm2, %v974_v8  ;;  %v1144_v23 = vadd.f32 %v1143_v21, %v975_v20 }
 0x607   : > { %1851 = vmatpush3.msra.mxu1 %v1146_v22  ;;  %1852 = vmatprep.mubr.msk.f32.mxu1 %vm2304_vm0, %v2303_v0 }
 0x608   : > { %1866 = vmatprep.subr.mxu1 %v2303_v0  ;;  %v1221_v24 = vmul.f32 0.25, %v1144_v23 }
 0x60a   : > { %1853 = vmatmul.mubr.msk.f32.vlgmr.msra.gmra.mxu1 %vm543_vm2, %v1143_v21  ;;  %1222 = vst.msk [vmem:[%s450_s16] sm:$0xff] %vm543_vm2, %v1221_v24 }
 0x60b   : > { %1874 = vmatprep.mubr.msk.f32.mxu1 %vm2304_vm0, %v2303_v0  ;;  %1867 = vmatpush3.msra.mxu1 %v1350_v53 }
 0x60c   : > { %1868 = vmatprep.subr.mxu1 %v2303_v0 }
 0x60d   : > { %1869 = vmatpush3.msra.mxu1 %v1349_v54 }
 0x60e   : > { %1870 = vmatprep.subr.mxu1 %v2303_v0 }
 0x60f   : > { %1871 = vmatpush3.msra.mxu1 %v1348_v18 }
 0x610   : > { %1872 = vmatprep.subr.mxu1 %v2303_v0 }
 0x6c2   : > { %v879_v29 = vpop.f32.mrf.mxu1 }
 0x6c3   : > { %1224 = vrot.lane.b32.xlu1 %v879_v29, %s2316_s28 }
 0x6c4   : > { %v1834_v30 = vpop.f32.mrf.mxu1 }
 0x6c6   : > { %v1048_v31 = vpop.f32.mrf.mxu1 }
 0x6c7   : > { %1228 = vrot.lane.b32.xlu0 %v1048_v31, %s2317_s22 }
 0x6c8   : > { %v1844_v32 = vpop.f32.mrf.mxu1 }
 0x6ca   : > { %v1217_v33 = vpop.f32.mrf.mxu1 }
 0x6cb   : > { %1232 = vrot.lane.b32.xlu1 %v1217_v33, %s2318_s23 }
 0x6cc   : > { %v1854_v34 = vpop.f32.mrf.mxu1 }
 0x735   : > { %v1225_v35 = vpop.permute.xlu1 %1224 }
 0x736   : > { %v1235_v37 = vsel %vm543_vm2, %v2670_v44, %v1225_v35 }
 0x739   : > { %v1229_v36 = vpop.permute.xlu0 %1228 }
 0x73a   : > { %v1237_v38 = vsel %vm1236_vm4, %v1235_v37, %v1229_v36 }
 0x73d   : > { %v1233_v39 = vpop.permute.xlu1 %1232 }
 0x73e   : > { %v1239_v40 = vsel %vm1238_vm5, %v1237_v38, %v1233_v39 }
 0x73f   : > { %1864 = vmatmul.mubr.msk.f32.vlgmr.msra.gmra.mxu0 %vm463_vm1, %v1239_v40 }
 0x740   : > { %1885 = vmatprep.mubr.msk.f32.mxu0 %vm2304_vm0, %v2303_v0  ;;  %1878 = vmatpush3.msra.mxu0 %v1432_v55 }
 0x741   : > { %1879 = vmatprep.subr.mxu0 %v2303_v0 }
 0x742   : > { %1880 = vmatpush3.msra.mxu0 %v1431_v4 }
 0x743   : > { %1881 = vmatprep.subr.mxu0 %v2303_v0 }
 0x744   : > { %1882 = vmatpush3.msra.mxu0 %v1430_v6 }
 0x745   : > { %1883 = vmatprep.subr.mxu0 %v2303_v0 }
 0x746   : > { %1884 = vmatpush3.msra.mxu0 %v1429_v7 }
 0x7ff   : > { %v1318_v43 = vpop.f32.mrf.mxu0 }
 0x800   : > { %v1319_v45 = vadd.f32 %v1318_v43, %v1248_v42 }
 0x801   : > { %v1865_v44 = vpop.f32.mrf.mxu0 }
 0x802   : > { %v1322_v46 = vadd.f32 %v1319_v45, %v2610_v5  ;;  %v1347_v5 = vld [vmem:[#allocation10] sm:$0xff] }
 0x803   : > { %1873 = vmatpush3.msra.mxu1 %v1347_v5 }
 0x804   : > { %v1323_v47 = vsel %vm463_vm1, %v1322_v46, 0.0 }
 0x805   : > { %1324 = vadd.xlane.f32.xlu0 %v1323_v47 }
 0x88e   : > { %v1325_v48 = vpop.xlane.xlu0 %1324 }
 0x88f   : > { %v1327_v49 = vmul.f32 0.03125, %v1325_v48 }
 0x891   : > { %v1328_v50 = vsub.f32 %v1322_v46, %v1327_v49 }
 0x893   : > { %v1329_v51 = vmul.f32 %v1328_v50, %v1328_v50 }
 0x895   : > { %v1330_v52 = vsel %vm463_vm1, %v1329_v51, 0.0 }
 0x896   : > { %1331 = vadd.xlane.f32.xlu1 %v1330_v52 }
 0x91f   : > { %v1332_v56 = vpop.xlane.xlu1 %1331 }
 0x920   : > { %v1333_v57 = vmul.f32 0.03125, %v1332_v56 }
 0x922   : > { %v1334_v58 = vadd.f32 1e-05, %v1333_v57 }
 0x924   : > { %2019 = vrsqrt.f32 %v1334_v58 }
 0x931   : > { %v2020_v62 = vpop.eup %2019 }
 0x932   : > { %v1336_v63 = vmul.f32 %v2020_v62, %v1328_v50 }
 0x934   : > { %v1341_v2 = vmul.f32 %v1340_v61, %v1336_v63 }
 0x936   : > { %v1346_v3 = vadd.f32 %v1345_v1, %v1341_v2 }
 0x938   : > { %1875 = vmatmul.mubr.msk.f32.vlgmr.msra.gmra.mxu1 %vm463_vm1, %v1346_v3 }
 0x9f8   : > { %v1424_v11 = vpop.f32.mrf.mxu1 }
 0x9f9   : > { %v1425_v12 = vadd.f32 %v1424_v11, %v1354_v10 }
 0x9fa   : > { %v1876_v13 = vpop.f32.mrf.mxu1 }
 0x9fb   : > { %v1428_v14 = vmax.f32 %v1425_v12, 0.0 }
 0x9fd   : > { %1886 = vmatmul.mubr.msk.f32.vlgmr.msra.gmra.mxu0 %vm463_vm1, %v1428_v14 }
 0xabd   : > { %v1506_v19 = vpop.f32.mrf.mxu0 }
 0xabe   : > { %v1507_v0 = vadd.f32 %v1506_v19, %v1436_v16 }
 0xabf   : > { %v1887_v8 = vpop.f32.mrf.mxu0 }
 0xac0   : > { %v1510_v20 = vadd.f32 %v1507_v0, %v1346_v3 }
 0xac2   : > { %v1511_v21 = vsel %vm463_vm1, %v1510_v20, 0.0 }
 0xac3   : > { %1512 = vadd.xlane.f32.xlu0 %v1511_v21 }
 0xb4c   : > { %v1513_v22 = vpop.xlane.xlu0 %1512 }
 0xb4d   : > { %v1514_v23 = vmul.f32 0.03125, %v1513_v22 }
 0xb4f   : > { %v1515_v24 = vsub.f32 %v1510_v20, %v1514_v23 }
 0xb51   : > { %v1516_v25 = vmul.f32 %v1515_v24, %v1515_v24 }
 0xb53   : > { %v1517_v26 = vsel %vm463_vm1, %v1516_v25, 0.0 }
 0xb54   : > { %1518 = vadd.xlane.f32.xlu0 %v1517_v26 }
 0xb55   : > { %2196 = shalt.err (!%p2193_p10)
}
 0xb56   : > { %s2197_s28 = scalar_lea.hbm %s1565_s24, 128  ;;  %s2201_s23 = scalar_lea.hbm %s2807_s9, 256 }
 0xb57   : > { %p2198_p3 = scmp.ne.s32.totalorder %s1565_s24, %s2197_s28  ;;  %p2202_p8 = scmp.lt.s32.totalorder %s1565_s24, %s2807_s9 }
 0xb58   : > { %p2203_p13 = scmp.lt.s32.totalorder %s2201_s23, %s2197_s28 }
 0xb59   : > { %p2199_p7 = pnand %p2198_p3, %p2839_p9 }
 0xb5a   : > { %p2204_p0 = por %p2203_p13, %p2202_p8 }
 0xb5b   : > { %p2200_p5 = pneg %p2199_p7 }
 0xb5d   : > { %p2205_p2 = pnand %p2204_p0, %p2200_p5 }
 0xb5f   : > { %2208 = shalt.err (!%p2205_p2)
}
 0xb60   : > { %1909 = dma.vmem_to_hbm [thread:$0]  (%p2839_p9), %s1568_s27, 128, %s1565_s24, %s1541_s5   ;;  %v1526_v30 = vsub.s32 5, %v2639_v17  ;;  %v1531_v31 = vsub.s32 6, %v2639_v17 }
 0xb61   : > { %s443_s4 = scalar_lea.vmem [#allocation13], %s2576_s29  ;;  %s1552_s5 = scalar_lea.hbm %s2806_s8, %s1764_s19 }
 0xb62   : > { %v1527_v32 = vrot.slane %v2709_v41, %v1526_v30  ;;  %v1532_v35 = vrot.slane %v2709_v41, %v1531_v31  ;;  %s1554_s25 = sshll.u32 %s443_s4, 4  ;;  %s1536_s13 = scalar_lea.sflag [#allocation4], %s2573_s0  ;;  %s1555_s25 = int_to_ptr.vmem [resolvable:$true] %s1554_s25 }
 0xb63   : > { %s2209_s6 = scalar_lea.vmem %s1555_s25, 128  ;;  %s2320_s21 = smov [#allocation13]  }
 0xb64   : > { %p2210_p11 = scmp.ne.s32.totalorder %s1555_s25, %s2209_s6  ;;  %s2213_s18 = sshll.u32 %s2320_s21, 4  ;;  %s2214_s18 = int_to_ptr.vmem [resolvable:$false] %s2213_s18 }
 0xb65   : > { %s2215_s29 = scalar_lea.vmem %s2214_s18, 256  ;;  %p2216_p4 = scmp.lt.s32.totalorder %s1555_s25, %s2214_s18 }
 0xb66   : > { %p2211_p12 = pnand %p2210_p11, %p2839_p9  ;;  %p2217_p6 = scmp.lt.s32.totalorder %s2215_s29, %s2209_s6 }
 0xb68   : > { %p2212_p1 = pneg %p2211_p12  ;;  %p2218_p10 = por %p2217_p6, %p2216_p4 }
 0xb6a   : > { %p2219_p3 = pnand %p2218_p10, %p2212_p1 }
 0xbdd   : > { %v1519_v27 = vpop.xlane.xlu0 %1518 }
 0xbde   : > { %v1520_v28 = vmul.f32 0.03125, %v1519_v27 }
 0xbe0   : > { %v1521_v29 = vadd.f32 1e-05, %v1520_v28 }
 0xbe2   : > { %2021 = vrsqrt.f32 %v1521_v29 }
 0xbef   : > { %v2022_v33 = vpop.eup %2021 }
 0xbf0   : > { %v1523_v34 = vmul.f32 %v2022_v33, %v1515_v24 }
 0xbf2   : > { %v1528_v36 = vmul.f32 %v1527_v32, %v1523_v34 }
 0xbf4   : > { %v1533_v37 = vadd.f32 %v1532_v35, %v1528_v36 }
 0xbf6   : > { %1534 = vst.msk [vmem:[%s443_s4] sm:$0xff] %vm463_vm1, %v1533_v37 }
 0xbf7   : > { %2222 = shalt.err (!%p2219_p3)
}
 0xbf8   : > { %s2223_s15 = scalar_lea.hbm %s1552_s5, 128  ;;  %s2227_s28 = scalar_lea.hbm %s2806_s8, 256 }
 0xbf9   : > { %p2224_p7 = scmp.ne.s32.totalorder %s1552_s5, %s2223_s15  ;;  %p2228_p13 = scmp.lt.s32.totalorder %s1552_s5, %s2806_s8 }
 0xbfa   : > { %p2229_p0 = scmp.lt.s32.totalorder %s2227_s28, %s2223_s15 }
 0xbfb   : > { %p2225_p5 = pnand %p2224_p7, %p2839_p9 }
 0xbfc   : > { %p2230_p2 = por %p2229_p0, %p2228_p13 }
 0xbfd   : > { %p2226_p8 = pneg %p2225_p5 }
 0xbff   : > { %p2231_p11 = pnand %p2230_p2, %p2226_p8 }
 0xc01   : > { %2234 = shalt.err (!%p2231_p11)
}
 0xc02   : > { %1908 = dma.vmem_to_hbm [thread:$0]  (%p2839_p9), %s1555_s25, 128, %s1552_s5, %s1536_s13  }
 0xc03 PF: > { %s1579_s23 = sand.u32 1, %s2281_s30   ;;  %p2840_p12 = scmp.ne.s32.totalorder %s2827_s17, 0 }
 0xc04   : > { %p2841_p1 = scmp.ge.s32.totalorder %s2293_s12, 2  ;;  %s1580_s20 = scalar_lea.sflag [#allocation4], %s1579_s23 }
 0xc06   : > { %p1933_p4 = pnand %p2841_p1, %p2840_p12 }
 0xc08   : > { %p1934_p6 = pneg %p1933_p4 }
 0xc0a   : > { %2272 = dma.done.wait (%p1934_p6), %s1580_s20, 128  }
 0xc0b   : > { %2274 = vsyncadd (%p1934_p6), %s1580_s20, 4294967168  ;;  %s1589_s2 = scalar_lea.sflag [#allocation15], %s1579_s23 }
 0xc0c   : > { %2276 = dma.done.wait (%p1934_p6), %s1589_s2, 128  }
 0xc0d   : > { %2278 = vsyncadd (%p1934_p6), %s1589_s2, 4294967168  ;;  %s2842_s14 = sld [smem:[#allocation23_spill]]  ;;  %p31_p9 = scmp.ge.s32.totalorder %s2472_s26, 4  }
 0xc0e   : > { %s2843_s30 = smov %s2285_s10  ;;  %s2844_s10 = smov %s2289_s11 }
 0xc0f   : > { %s2846_s12 = smov %s2472_s26  ;;  %33 = sbr.rel (!%p31_p9) target bundleno = 17 (0x11), region = 143 }
 0xc13   : > { %s2845_s11 = smov %s2842_s14 }
 0xc14   :  { %1594 = vsyncpa [#allocation3], 1 }
 0xc15   :  { %1596 = vsyncpa [#allocation3 + $0x1], 1 }
 0xc16   :  { %1597 = vsyncpa [#allocation6], 1 }
 0xc17   :  { %1599 = vsyncpa [#allocation6 + $0x1], 1 }
 0xc18   :  { %1600 = vsyncpa [#allocation9], 1 }
 0xc19   :  { %1601 = vsyncpa [#allocation12], 1 }
 0xc1a   :  { %1602 = vsyncpa [#allocation4], 1 }
 0xc1b   :  { %1604 = vsyncpa [#allocation4 + $0x1], 1 }
 0xc1c   :  { %1605 = vsyncpa [#allocation15], 1 }
 0xc1d   :  { %1607 = vsyncpa [#allocation15 + $0x1], 1 }

</bundles_post_ra>
